<compile_context>
chip_gen: v7x
topology: tpu7x:2x2x1
jax: 0.10.0
libtpu: 0.0.40
codegen_flags: <defaults>
</compile_context>

<pallas_src>
import functools
import math

import jax
import jax.numpy as jnp
from jax.experimental import pallas as pl
from jax.experimental.pallas import tpu as pltpu


# Logical hidden sizes (PyTorch model) and their lane-padded counterparts.
HID1, HID2, HID3 = 500, 300, 100
H1P, H2P, H3P, OUTP = 512, 384, 128, 128


def _round_up(x, m):
    return (x + m - 1) // m * m


def _fused_kernel(obs_ref, w1_ref, w2_ref, w34_ref, b_ref, out_ref):
    """Both heads in one body.  One grid step == one batch tile.

    obs_ref : (TB, obs_pad)        bf16, column obs_dim holds 1.0 (bias-1 input)
    w1_ref  : (obs_pad, 2*H1P)     bf16, actor cols 0:512, critic cols 512:1024,
                                   row obs_dim holds both layer-1 biases
    w2_ref  : (2, H1P, H2P)        bf16, [0]=actor W2, [1]=critic W2
    w34_ref : (2, H2P+H3P, OUTP)   bf16, rows 0:384 = W3, rows 384:512 = W4
    b_ref   : (8, H1P)             f32 bias slab for layers 2..4
    out_ref : (TB, 2*OUTP)         f32, actor lanes 0:128, critic lanes 128:256
    """
    x = obs_ref[...]                                   # (TB, obs_pad) bf16
    b = b_ref[...]                                     # (8, 512) f32

    # Layer 1: one matmul for both heads; bias folded into W1 via the ones column.
    h1 = jnp.tanh(jnp.dot(x, w1_ref[...],
                          preferred_element_type=jnp.float32))        # (TB, 1024)
    h1a = h1[:, :H1P].astype(jnp.bfloat16)
    h1c = h1[:, H1P:].astype(jnp.bfloat16)

    # Layer 2 (per head).
    h2a = jnp.tanh(jnp.dot(h1a, w2_ref[0],
                           preferred_element_type=jnp.float32) + b[0, :H2P])
    h2c = jnp.tanh(jnp.dot(h1c, w2_ref[1],
                           preferred_element_type=jnp.float32) + b[1, :H2P])

    # Layers 3 + 4 from the merged per-head (512, 128) slab (static, tile-aligned slices).
    w34a = w34_ref[0]
    w34c = w34_ref[1]
    h3a = jnp.tanh(jnp.dot(h2a.astype(jnp.bfloat16), w34a[:H2P],
                           preferred_element_type=jnp.float32) + b[2, :H3P])
    h3c = jnp.tanh(jnp.dot(h2c.astype(jnp.bfloat16), w34c[:H2P],
                           preferred_element_type=jnp.float32) + b[3, :H3P])

    ya = jnp.tanh(jnp.dot(h3a.astype(jnp.bfloat16), w34a[H2P:],
                          preferred_element_type=jnp.float32) + b[4, :OUTP])   # actor: final Tanh
    yc = jnp.dot(h3c.astype(jnp.bfloat16), w34c[H2P:],
                 preferred_element_type=jnp.float32) + b[5, :OUTP]             # critic: linear

    out_ref[:, :OUTP] = ya
    out_ref[:, OUTP:] = yc


def pack_params(params):
    """One-time pad + bf16-cast + stack of PyTorch-style (in,out)/(1,out) f32 params.

    Layout (kernel order):
      w1  : (obs_pad, 1024) bf16  actor||critic layer-1 weights; row obs_dim = biases
      w2  : (2, 512, 384)   bf16  layer-2 weights per head
      w34 : (2, 512, 128)   bf16  layer-3 (rows 0:384) and layer-4 (rows 384:512) per head
      b   : (8, 512)        f32   biases for layers 2..4 (rows: a2,c2,a3,c3,a4,c4)
    Padding is zeros, so padded lanes stay exactly 0 through tanh and never
    contribute downstream (tanh(0)=0, zero weight rows).
    """
    obs_dim = params["aw1"].shape[0]
    action_dim = params["aw4"].shape[1]
    obs_pad = _round_up(obs_dim + 1, 128)   # +1: spare column carries the bias-1 "ones" input

    bf16 = jnp.bfloat16

    w1 = jnp.zeros((obs_pad, 2 * H1P), bf16)
    w1 = w1.at[:obs_dim, :HID1].set(params["aw1"].astype(bf16))
    w1 = w1.at[obs_dim, :HID1].set(params["ab1"].reshape(-1).astype(bf16))
    w1 = w1.at[:obs_dim, H1P:H1P + HID1].set(params["cw1"].astype(bf16))
    w1 = w1.at[obs_dim, H1P:H1P + HID1].set(params["cb1"].reshape(-1).astype(bf16))

    w2 = jnp.zeros((2, H1P, H2P), bf16)
    w2 = w2.at[0, :HID1, :HID2].set(params["aw2"].astype(bf16))
    w2 = w2.at[1, :HID1, :HID2].set(params["cw2"].astype(bf16))

    w34 = jnp.zeros((2, H2P + H3P, OUTP), bf16)
    w34 = w34.at[0, :HID2, :HID3].set(params["aw3"].astype(bf16))
    w34 = w34.at[1, :HID2, :HID3].set(params["cw3"].astype(bf16))
    w34 = w34.at[0, H2P:H2P + HID3, :action_dim].set(params["aw4"].astype(bf16))
    w34 = w34.at[1, H2P:H2P + HID3, :1].set(params["cw4"].astype(bf16))

    b = jnp.zeros((8, H1P), jnp.float32)
    b = b.at[0, :HID2].set(params["ab2"].reshape(-1))
    b = b.at[1, :HID2].set(params["cb2"].reshape(-1))
    b = b.at[2, :HID3].set(params["ab3"].reshape(-1))
    b = b.at[3, :HID3].set(params["cb3"].reshape(-1))
    b = b.at[4, :action_dim].set(params["ab4"].reshape(-1))
    b = b.at[5, :1].set(params["cb4"].reshape(-1))

    return {"w1": w1, "w2": w2, "w34": w34, "b": b}


def actor_critic_forward(obs, packed, *, action_dim):
    """obs: (B, obs_dim) float32.  packed: output of pack_params()."""
    B, obs_dim = obs.shape
    obs_pad = packed["w1"].shape[0]

    # Batch tiling: one tile for the tiny-B RL path; 256-row tiles (MXU height on
    # v6e/v7x) for large B, with weights VMEM-resident across tiles.
    if B <= 256:
        tb = max(16, _round_up(B, 16))           # bf16 native sublane tile = 16
    else:
        tb = 256
    B_pad = _round_up(max(B, tb), tb)
    n_tiles = B_pad // tb

    # Pad + cast obs to bf16 in the wrapper; the spare column obs_dim carries the
    # "1" that multiplies the folded layer-1 bias row of W1.
    obs_p = (jnp.zeros((B_pad, obs_pad), jnp.bfloat16)
             .at[:B, :obs_dim].set(obs.astype(jnp.bfloat16))
             .at[:, obs_dim].set(1.0))

    out = pl.pallas_call(
        _fused_kernel,
        grid=(n_tiles,),
        in_specs=[
            pl.BlockSpec((tb, obs_pad), lambda i: (i, 0)),              # obs tile
            pl.BlockSpec((obs_pad, 2 * H1P), lambda i: (0, 0)),         # W1 (resident)
            pl.BlockSpec((2, H1P, H2P), lambda i: (0, 0, 0)),           # W2 stack (resident)
            pl.BlockSpec((2, H2P + H3P, OUTP), lambda i: (0, 0, 0)),    # W3|W4 stack (resident)
            pl.BlockSpec((8, H1P), lambda i: (0, 0)),                   # bias slab (resident)
        ],
        out_specs=pl.BlockSpec((tb, 2 * OUTP), lambda i: (i, 0)),
        out_shape=jax.ShapeDtypeStruct((B_pad, 2 * OUTP), jnp.float32),
        compiler_params=pltpu.CompilerParams(
            dimension_semantics=("parallel",)),   # v7x: batch tiles shard across TCs
    )(obs_p, packed["w1"], packed["w2"], packed["w34"], packed["b"])

    actor_out = out[:B, :action_dim]
    critic_out = out[:B, OUTP:OUTP + 1]
    return actor_out, critic_out


def init_params(key, obs_dim, action_dim):
    """PyTorch-style Linear init U(-1/sqrt(fan_in), 1/sqrt(fan_in)); weights (in,out)."""
    dims_actor = [(obs_dim, HID1), (HID1, HID2), (HID2, HID3), (HID3, action_dim)]
    dims_critic = [(obs_dim, HID1), (HID1, HID2), (HID2, HID3), (HID3, 1)]
    params = {}
    keys = jax.random.split(key, 16)
    idx = 0
    for prefix, dims in (("a", dims_actor), ("c", dims_critic)):
        for li, (fan_in, fan_out) in enumerate(dims, start=1):
            bound = 1.0 / math.sqrt(fan_in)
            w = jax.random.uniform(keys[idx], (fan_in, fan_out), jnp.float32,
                                   -bound, bound)
            idx += 1
            b = jax.random.uniform(keys[idx], (1, fan_out), jnp.float32,
                                   -bound, bound)
            idx += 1
            params[f"{prefix}w{li}"] = w
            params[f"{prefix}b{li}"] = b
    return params


def _reference_forward(obs, params):
    """Pure-JAX f32 reference of the PyTorch forward()."""
    def head(x, prefix, last_tanh):
        for li in range(1, 5):
            x = x @ params[f"{prefix}w{li}"] + params[f"{prefix}b{li}"]
            if li < 4 or last_tanh:
                x = jnp.tanh(x)
        return x
    return head(obs, "a", True), head(obs, "c", False)


if __name__ == "__main__":
    obs_dim, action_dim, batch = 64, 2, 2
    key = jax.random.PRNGKey(0)
    k_obs, k_params = jax.random.split(key)

    obs = jax.random.normal(k_obs, (batch, obs_dim), jnp.float32)
    params = init_params(k_params, obs_dim, action_dim)
    packed = pack_params(params)          # one-time weight prep (pad + bf16 + stack + bias-1 fold)

    fwd = jax.jit(functools.partial(actor_critic_forward, action_dim=action_dim))
    actor_out, critic_out = jax.block_until_ready(fwd(obs, packed))

    ref_actor, ref_critic = _reference_forward(obs, params)
    assert actor_out.shape == (batch, action_dim)
    assert critic_out.shape == (batch, 1)
    # bf16 weights/activations on the MXU -> looser tolerance vs the f32 reference.
    assert jnp.allclose(actor_out, ref_actor, atol=5e-2, rtol=5e-2)
    assert jnp.allclose(critic_out, ref_critic, atol=5e-2, rtol=5e-2)

    print("KERNEL_OK")
</pallas_src>

<mosaic_0001>
module attributes {stable_mosaic.version = 11 : i64} {
  func.func @_fused_kernel(%arg0: i32, %arg1: memref<16x128xbf16, #tpu.memory_space<vmem>>, %arg2: memref<128x1024xbf16, #tpu.memory_space<vmem>>, %arg3: memref<2x512x384xbf16, #tpu.memory_space<vmem>>, %arg4: memref<2x512x128xbf16, #tpu.memory_space<vmem>>, %arg5: memref<8x512xf32, #tpu.memory_space<vmem>>, %arg6: memref<16x256xf32, #tpu.memory_space<vmem>>) attributes {dimension_semantics = [#tpu.dimension_semantics<parallel>], iteration_bounds = array<i64: 1>, scalar_prefetch = 0 : i64, scratch_operands = 0 : i64, tpu.core_type = #tpu.core_type<tc>, window_params = [{transform_indices = @transform_0, window_bounds = array<i64: 16, 128>}, {pipeline_mode = #tpu.pipeline_mode<synchronous>, transform_indices = @transform_1, window_bounds = array<i64: 128, 1024>}, {pipeline_mode = #tpu.pipeline_mode<synchronous>, transform_indices = @transform_2, window_bounds = array<i64: 2, 512, 384>}, {pipeline_mode = #tpu.pipeline_mode<synchronous>, transform_indices = @transform_3, window_bounds = array<i64: 2, 512, 128>}, {pipeline_mode = #tpu.pipeline_mode<synchronous>, transform_indices = @transform_4, window_bounds = array<i64: 8, 512>}, {transform_indices = @transform_5, window_bounds = array<i64: 16, 256>}]} {
    %c0 = arith.constant 0 : index
    %c0_0 = arith.constant 0 : index
    %0 = vector.load %arg1[%c0, %c0_0] : memref<16x128xbf16, #tpu.memory_space<vmem>>, vector<16x128xbf16>
    %c0_1 = arith.constant 0 : index
    %c0_2 = arith.constant 0 : index
    %1 = vector.load %arg5[%c0_1, %c0_2] : memref<8x512xf32, #tpu.memory_space<vmem>>, vector<8x512xf32>
    %c0_3 = arith.constant 0 : index
    %c0_4 = arith.constant 0 : index
    %2 = vector.load %arg2[%c0_3, %c0_4] : memref<128x1024xbf16, #tpu.memory_space<vmem>>, vector<128x1024xbf16>
    %cst = arith.constant dense<0.000000e+00> : vector<16x1024xf32>
    %3 = tpu.matmul %0, %2, %cst {dimension_numbers = #tpu.dot_dimension_numbers<[1], [0], [0], [1], [0, 0, 1, 1], [], []>} : vector<16x128xbf16>, vector<128x1024xbf16>, vector<16x1024xf32> -> vector<16x1024xf32>
    %4 = math.tanh %3 : vector<16x1024xf32>
    %5 = vector.extract_strided_slice %4 {offsets = [0, 0], sizes = [16, 512], strides = [1, 1]} : vector<16x1024xf32> to vector<16x512xf32>
    %6 = arith.truncf %5 : vector<16x512xf32> to vector<16x512xbf16>
    %7 = vector.extract_strided_slice %4 {offsets = [0, 512], sizes = [16, 512], strides = [1, 1]} : vector<16x1024xf32> to vector<16x512xf32>
    %8 = arith.truncf %7 : vector<16x512xf32> to vector<16x512xbf16>
    %c0_5 = arith.constant 0 : index
    %c0_6 = arith.constant 0 : index
    %c0_7 = arith.constant 0 : index
    %9 = vector.load %arg3[%c0_5, %c0_6, %c0_7] : memref<2x512x384xbf16, #tpu.memory_space<vmem>>, vector<1x512x384xbf16>
    %10 = vector.shape_cast %9 : vector<1x512x384xbf16> to vector<512x384xbf16>
    %cst_8 = arith.constant dense<0.000000e+00> : vector<16x384xf32>
    %11 = tpu.matmul %6, %10, %cst_8 {dimension_numbers = #tpu.dot_dimension_numbers<[1], [0], [0], [1], [0, 0, 1, 1], [], []>} : vector<16x512xbf16>, vector<512x384xbf16>, vector<16x384xf32> -> vector<16x384xf32>
    %12 = vector.extract_strided_slice %1 {offsets = [0, 0], sizes = [1, 384], strides = [1, 1]} : vector<8x512xf32> to vector<1x384xf32>
    %13 = vector.shape_cast %12 : vector<1x384xf32> to vector<384xf32>
    %14 = vector.shape_cast %13 : vector<384xf32> to vector<1x384xf32>
    %15 = vector.broadcast %14 : vector<1x384xf32> to vector<16x384xf32>
    %16 = arith.addf %11, %15 : vector<16x384xf32>
    %17 = math.tanh %16 : vector<16x384xf32>
    %c1 = arith.constant 1 : index
    %c0_9 = arith.constant 0 : index
    %c0_10 = arith.constant 0 : index
    %18 = vector.load %arg3[%c1, %c0_9, %c0_10] : memref<2x512x384xbf16, #tpu.memory_space<vmem>>, vector<1x512x384xbf16>
    %19 = vector.shape_cast %18 : vector<1x512x384xbf16> to vector<512x384xbf16>
    %cst_11 = arith.constant dense<0.000000e+00> : vector<16x384xf32>
    %20 = tpu.matmul %8, %19, %cst_11 {dimension_numbers = #tpu.dot_dimension_numbers<[1], [0], [0], [1], [0, 0, 1, 1], [], []>} : vector<16x512xbf16>, vector<512x384xbf16>, vector<16x384xf32> -> vector<16x384xf32>
    %21 = vector.extract_strided_slice %1 {offsets = [1, 0], sizes = [1, 384], strides = [1, 1]} : vector<8x512xf32> to vector<1x384xf32>
    %22 = vector.shape_cast %21 : vector<1x384xf32> to vector<384xf32>
    %23 = vector.shape_cast %22 : vector<384xf32> to vector<1x384xf32>
    %24 = vector.broadcast %23 : vector<1x384xf32> to vector<16x384xf32>
    %25 = arith.addf %20, %24 : vector<16x384xf32>
    %26 = math.tanh %25 : vector<16x384xf32>
    %c0_12 = arith.constant 0 : index
    %c0_13 = arith.constant 0 : index
    %c0_14 = arith.constant 0 : index
    %27 = vector.load %arg4[%c0_12, %c0_13, %c0_14] : memref<2x512x128xbf16, #tpu.memory_space<vmem>>, vector<1x512x128xbf16>
    %28 = vector.shape_cast %27 : vector<1x512x128xbf16> to vector<512x128xbf16>
    %c1_15 = arith.constant 1 : index
    %c0_16 = arith.constant 0 : index
    %c0_17 = arith.constant 0 : index
    %29 = vector.load %arg4[%c1_15, %c0_16, %c0_17] : memref<2x512x128xbf16, #tpu.memory_space<vmem>>, vector<1x512x128xbf16>
    %30 = vector.shape_cast %29 : vector<1x512x128xbf16> to vector<512x128xbf16>
    %31 = arith.truncf %17 : vector<16x384xf32> to vector<16x384xbf16>
    %32 = vector.extract_strided_slice %28 {offsets = [0, 0], sizes = [384, 128], strides = [1, 1]} : vector<512x128xbf16> to vector<384x128xbf16>
    %cst_18 = arith.constant dense<0.000000e+00> : vector<16x128xf32>
    %33 = tpu.matmul %31, %32, %cst_18 {dimension_numbers = #tpu.dot_dimension_numbers<[1], [0], [0], [1], [0, 0, 1, 1], [], []>} : vector<16x384xbf16>, vector<384x128xbf16>, vector<16x128xf32> -> vector<16x128xf32>
    %34 = vector.extract_strided_slice %1 {offsets = [2, 0], sizes = [1, 128], strides = [1, 1]} : vector<8x512xf32> to vector<1x128xf32>
    %35 = vector.shape_cast %34 : vector<1x128xf32> to vector<128xf32>
    %36 = vector.shape_cast %35 : vector<128xf32> to vector<1x128xf32>
    %37 = vector.broadcast %36 : vector<1x128xf32> to vector<16x128xf32>
    %38 = arith.addf %33, %37 : vector<16x128xf32>
    %39 = math.tanh %38 : vector<16x128xf32>
    %40 = arith.truncf %26 : vector<16x384xf32> to vector<16x384xbf16>
    %41 = vector.extract_strided_slice %30 {offsets = [0, 0], sizes = [384, 128], strides = [1, 1]} : vector<512x128xbf16> to vector<384x128xbf16>
    %cst_19 = arith.constant dense<0.000000e+00> : vector<16x128xf32>
    %42 = tpu.matmul %40, %41, %cst_19 {dimension_numbers = #tpu.dot_dimension_numbers<[1], [0], [0], [1], [0, 0, 1, 1], [], []>} : vector<16x384xbf16>, vector<384x128xbf16>, vector<16x128xf32> -> vector<16x128xf32>
    %43 = vector.extract_strided_slice %1 {offsets = [3, 0], sizes = [1, 128], strides = [1, 1]} : vector<8x512xf32> to vector<1x128xf32>
    %44 = vector.shape_cast %43 : vector<1x128xf32> to vector<128xf32>
    %45 = vector.shape_cast %44 : vector<128xf32> to vector<1x128xf32>
    %46 = vector.broadcast %45 : vector<1x128xf32> to vector<16x128xf32>
    %47 = arith.addf %42, %46 : vector<16x128xf32>
    %48 = math.tanh %47 : vector<16x128xf32>
    %49 = arith.truncf %39 : vector<16x128xf32> to vector<16x128xbf16>
    %50 = vector.extract_strided_slice %28 {offsets = [384, 0], sizes = [128, 128], strides = [1, 1]} : vector<512x128xbf16> to vector<128x128xbf16>
    %cst_20 = arith.constant dense<0.000000e+00> : vector<16x128xf32>
    %51 = tpu.matmul %49, %50, %cst_20 {dimension_numbers = #tpu.dot_dimension_numbers<[1], [0], [0], [1], [0, 0, 1, 1], [], []>} : vector<16x128xbf16>, vector<128x128xbf16>, vector<16x128xf32> -> vector<16x128xf32>
    %52 = vector.extract_strided_slice %1 {offsets = [4, 0], sizes = [1, 128], strides = [1, 1]} : vector<8x512xf32> to vector<1x128xf32>
    %53 = vector.shape_cast %52 : vector<1x128xf32> to vector<128xf32>
    %54 = vector.shape_cast %53 : vector<128xf32> to vector<1x128xf32>
    %55 = vector.broadcast %54 : vector<1x128xf32> to vector<16x128xf32>
    %56 = arith.addf %51, %55 : vector<16x128xf32>
    %57 = math.tanh %56 : vector<16x128xf32>
    %58 = arith.truncf %48 : vector<16x128xf32> to vector<16x128xbf16>
    %59 = vector.extract_strided_slice %30 {offsets = [384, 0], sizes = [128, 128], strides = [1, 1]} : vector<512x128xbf16> to vector<128x128xbf16>
    %cst_21 = arith.constant dense<0.000000e+00> : vector<16x128xf32>
    %60 = tpu.matmul %58, %59, %cst_21 {dimension_numbers = #tpu.dot_dimension_numbers<[1], [0], [0], [1], [0, 0, 1, 1], [], []>} : vector<16x128xbf16>, vector<128x128xbf16>, vector<16x128xf32> -> vector<16x128xf32>
    %61 = vector.extract_strided_slice %1 {offsets = [5, 0], sizes = [1, 128], strides = [1, 1]} : vector<8x512xf32> to vector<1x128xf32>
    %62 = vector.shape_cast %61 : vector<1x128xf32> to vector<128xf32>
    %63 = vector.shape_cast %62 : vector<128xf32> to vector<1x128xf32>
    %64 = vector.broadcast %63 : vector<1x128xf32> to vector<16x128xf32>
    %65 = arith.addf %60, %64 : vector<16x128xf32>
    %c0_22 = arith.constant 0 : index
    %c0_23 = arith.constant 0 : index
    %66 = vector.load %arg6[%c0_22, %c0_23] : memref<16x256xf32, #tpu.memory_space<vmem>>, vector<16x128xf32>
    tpu.vector_store %arg6[%c0_22, %c0_23], %57 {strides = array<i32>} : memref<16x256xf32, #tpu.memory_space<vmem>>, vector<16x128xf32>,
    %c0_24 = arith.constant 0 : index
    %c128 = arith.constant 128 : index
    %67 = vector.load %arg6[%c0_24, %c128] : memref<16x256xf32, #tpu.memory_space<vmem>>, vector<16x128xf32>
    tpu.vector_store %arg6[%c0_24, %c128], %65 {strides = array<i32>} : memref<16x256xf32, #tpu.memory_space<vmem>>, vector<16x128xf32>,
    return
  }
  func.func @transform_0(%arg0: i32) -> (i32, i32) {
    %c0_i32 = arith.constant 0 : i32
    %c0_i32_0 = arith.constant 0 : i32
    return %arg0, %c0_i32 : i32, i32
  }
  func.func @transform_1(%arg0: i32) -> (i32, i32) {
    %c0_i32 = arith.constant 0 : i32
    %c0_i32_0 = arith.constant 0 : i32
    %c0_i32_1 = arith.constant 0 : i32
    return %c0_i32, %c0_i32_0 : i32, i32
  }
  func.func @transform_2(%arg0: i32) -> (i32, i32, i32) {
    %c0_i32 = arith.constant 0 : i32
    %c0_i32_0 = arith.constant 0 : i32
    %c0_i32_1 = arith.constant 0 : i32
    %c0_i32_2 = arith.constant 0 : i32
    return %c0_i32, %c0_i32_0, %c0_i32_1 : i32, i32, i32
  }
  func.func @transform_3(%arg0: i32) -> (i32, i32, i32) {
    %c0_i32 = arith.constant 0 : i32
    %c0_i32_0 = arith.constant 0 : i32
    %c0_i32_1 = arith.constant 0 : i32
    %c0_i32_2 = arith.constant 0 : i32
    return %c0_i32, %c0_i32_0, %c0_i32_1 : i32, i32, i32
  }
  func.func @transform_4(%arg0: i32) -> (i32, i32) {
    %c0_i32 = arith.constant 0 : i32
    %c0_i32_0 = arith.constant 0 : i32
    %c0_i32_1 = arith.constant 0 : i32
    return %c0_i32, %c0_i32_0 : i32, i32
  }
  func.func @transform_5(%arg0: i32) -> (i32, i32) {
    %c0_i32 = arith.constant 0 : i32
    %c0_i32_0 = arith.constant 0 : i32
    return %arg0, %c0_i32 : i32, i32
  }
}

</mosaic_0001>

<bundles_post_ra>
// kernel: actor_critic_forward.1
= control target key start
LH: loop header
LB: loop body
LE: loop exit
PB: predicated region body
PF: predicated region fallthrough
CT: control target
= control target key end

     0   :  { %10 = vsyncpa [#allocation3], 0  ;;  %s4357_s0 = inlined_call_operand.vmem [shape: bf16[16,128], index: 0, kind: input, shape index: {}]   ;;  %s4358_s1 = inlined_call_operand.hbm [shape: bf16[128,1024], index: 1, kind: input, shape index: {}]   ;;  %s4359_s2 = inlined_call_operand.hbm [shape: bf16[2,512,384], index: 2, kind: input, shape index: {}]   ;;  %s4360_s3 = inlined_call_operand.hbm [shape: bf16[2,512,128], index: 3, kind: input, shape index: {}]   ;;  %s4361_s4 = inlined_call_operand.vmem [shape: f32[8,512], index: 4, kind: input, shape index: {}]   ;;  %s4362_s5 = inlined_call_operand.vmem [shape: f32[16,256], index: 5, kind: output, shape index: {}]  }
   0x1   :  { %11 = vsyncpa [#allocation5], 0  ;;  %s4161_s18 = smov [#allocation4]   ;;  %s4091_s22 = scalar_lea.hbm %s4359_s2, 24576 }
   0x2   :  { %s31_s19 = sshll.u32 %s4161_s18, 4  ;;  %p4092_p0 = scmp.ne.s32.totalorder %s4359_s2, %s4091_s22  ;;  %s32_s19 = int_to_ptr.vmem [resolvable:$true] %s31_s19 }
   0x3   :  { %p4095_p1 = scmp.lt.u32.totalorder %s4091_s22, %s4359_s2 }
   0x5   :  { %p4097_p2 = pnand %p4095_p1, %p4092_p0 }
   0x7   :  { %4100 = shalt.err (!%p4097_p2)
}
   0x8   :  { %s4101_s27 = scalar_lea.vmem %s32_s19, 24576  ;;  %p4106_p4 = scmp.lt.s32.totalorder %s32_s19, %s32_s19 }
   0x9   :  { %p4102_p3 = scmp.ne.s32.totalorder %s32_s19, %s4101_s27  ;;  %p4107_p5 = scmp.lt.s32.totalorder %s4101_s27, %s4101_s27 }
   0xb   :  { %p4108_p6 = por %p4107_p5, %p4106_p4 }
   0xd   :  { %p4109_p7 = pnand %p4108_p6, %p4102_p3 }
   0xf   :  { %4112 = shalt.err (!%p4109_p7)
}
  0x10   :  { %s4162_s28 = smov 192   ;;  %s4163_s29 = smov 12  }
  0x11   :  { %37 = dma.hbm_to_vmem [thread:$0]  %s4359_s2, 24576, %s32_s19, [#allocation5], %s4162_s28, %s4162_s28, %s4163_s29  }
  0x12   :  { %s4164_s7 = smov [#allocation2]   ;;  %s4113_s11 = scalar_lea.hbm %s4358_s1, 8192 }
  0x13   :  { %s19_s8 = sshll.u32 %s4164_s7, 4  ;;  %p4114_p8 = scmp.ne.s32.totalorder %s4358_s1, %s4113_s11  ;;  %s20_s8 = int_to_ptr.vmem [resolvable:$true] %s19_s8 }
  0x14   :  { %p4117_p9 = scmp.lt.u32.totalorder %s4113_s11, %s4358_s1 }
  0x16   :  { %p4119_p10 = pnand %p4117_p9, %p4114_p8 }
  0x18   :  { %4122 = shalt.err (!%p4119_p10)
}
  0x19   :  { %s4123_s16 = scalar_lea.vmem %s20_s8, 8192  ;;  %p4128_p12 = scmp.lt.s32.totalorder %s20_s8, %s20_s8 }
  0x1a   :  { %p4124_p11 = scmp.ne.s32.totalorder %s20_s8, %s4123_s16  ;;  %p4129_p13 = scmp.lt.s32.totalorder %s4123_s16, %s4123_s16 }
  0x1c   :  { %p4130_p0 = por %p4129_p13, %p4128_p12 }
  0x1e   :  { %p4131_p1 = pnand %p4130_p0, %p4124_p11 }
  0x20   :  { %4134 = shalt.err (!%p4131_p1)
}
  0x21   :  { %s4165_s2 = smov 512   ;;  %s4166_s17 = smov 32  }
  0x22   :  { %25 = dma.hbm_to_vmem [thread:$0]  %s4358_s1, 8192, %s20_s8, [#allocation3], %s4165_s2, %s4165_s2, %s4166_s17  }
  0x23   :  { %s4167_s20 = smov [#allocation6]   ;;  %s4135_s24 = scalar_lea.hbm %s4360_s3, 8192 }
  0x24   :  { %s43_s21 = sshll.u32 %s4167_s20, 4  ;;  %p4136_p2 = scmp.ne.s32.totalorder %s4360_s3, %s4135_s24  ;;  %s44_s21 = int_to_ptr.vmem [resolvable:$true] %s43_s21 }
  0x25   :  { %p4139_p3 = scmp.lt.u32.totalorder %s4135_s24, %s4360_s3 }
  0x27   :  { %p4141_p4 = pnand %p4139_p3, %p4136_p2 }
  0x29   :  { %4144 = shalt.err (!%p4141_p4)
}
  0x2a   :  { %s4145_s29 = scalar_lea.vmem %s44_s21, 8192  ;;  %p4150_p6 = scmp.lt.s32.totalorder %s44_s21, %s44_s21 }
  0x2b   :  { %p4146_p5 = scmp.ne.s32.totalorder %s44_s21, %s4145_s29  ;;  %p4151_p7 = scmp.lt.s32.totalorder %s4145_s29, %s4145_s29 }
  0x2d   :  { %p4152_p8 = por %p4151_p7, %p4150_p6 }
  0x2f   :  { %p4153_p9 = pnand %p4152_p8, %p4146_p5 }
  0x31   :  { %4156 = shalt.err (!%p4153_p9)
}
  0x32   :  { %s4168_s1 = smov 64   ;;  %s4169_s30 = smov 4  }
  0x33   :  { %49 = dma.hbm_to_vmem [thread:$0]  %s4360_s3, 8192, %s44_s21, [#allocation5], %s4168_s1, %s4168_s1, %s4169_s30  }
  0x34   :  { %4157 = dma.done.wait [#allocation3], 8192  }
  0x35   :  { %4158 = vsyncadd [#allocation3], 4294959104 }
  0x36   :  { %4159 = dma.done.wait [#allocation5], 32768  }
  0x37   :  { %4160 = vsyncadd [#allocation5], 4294934528  ;;  %v4170_v0 = vmov 0   ;;  %v67_v1 = vld [vmem:[#allocation2] sm:$0xff]  ;;  %v68_v13 = vld [vmem:[#allocation2 + $0x8] sm:$0xff]  ;;  %vm4172_vm0 = vmmov 0  }
  0x38   :  { %489 = vmatprep.mubr.bf16.mxu0 %v4170_v0  ;;  %532 = vmatprep.mubr.bf16.mxu1 %v4170_v0  ;;  %v71_v2 = vld [vmem:[#allocation2 + $0x20] sm:$0xff]  ;;  %v72_v14 = vld [vmem:[#allocation2 + $0x28] sm:$0xff]  ;;  %v69_v58 = vld [vmem:[#allocation2 + $0x10] sm:$0xff] }
  0x39   :  { %v75_v3 = vld [vmem:[#allocation2 + $0x40] sm:$0xff]  ;;  %v3107_v4 = vcombine.high %v67_v1, %v71_v2  ;;  %v3106_v5 = vcombine.low %v67_v1, %v71_v2  ;;  %v3109_v16 = vcombine.high %v68_v13, %v72_v14  ;;  %v3108_v17 = vcombine.low %v68_v13, %v72_v14  ;;  %v76_v18 = vld [vmem:[#allocation2 + $0x48] sm:$0xff]  ;;  %v73_v60 = vld [vmem:[#allocation2 + $0x30] sm:$0xff] }
  0x3a   :  { %v79_v6 = vld [vmem:[#allocation2 + $0x60] sm:$0xff]  ;;  %v80_v19 = vld [vmem:[#allocation2 + $0x68] sm:$0xff]  ;;  %v89_v13 = vld [vmem:[#allocation2 + $0xb0] sm:$0xff] }
  0x3b   :  { %v3115_v7 = vcombine.high %v75_v3, %v79_v6  ;;  %v83_v8 = vld [vmem:[#allocation2 + $0x80] sm:$0xff]  ;;  %457 = vmatprep.subr.bf16.mxu0 %v3107_v4  ;;  %v3114_v10 = vcombine.low %v75_v3, %v79_v6  ;;  %v84_v20 = vld [vmem:[#allocation2 + $0x88] sm:$0xff]  ;;  %500 = vmatprep.subr.bf16.mxu1 %v3109_v16  ;;  %v3117_v22 = vcombine.high %v76_v18, %v80_v19  ;;  %v77_v4 = vld [vmem:[#allocation2 + $0x50] sm:$0xff] }
  0x3c   :  { %v87_v9 = vld [vmem:[#allocation2 + $0xa0] sm:$0xff]  ;;  %458 = vmatpush1.bf16.msra.mxu0 %v3106_v5  ;;  %v88_v23 = vld [vmem:[#allocation2 + $0xa8] sm:$0xff]  ;;  %501 = vmatpush1.bf16.msra.mxu1 %v3108_v17  ;;  %v3116_v25 = vcombine.low %v76_v18, %v80_v19  ;;  %v3111_v3 = vcombine.high %v69_v58, %v73_v60  ;;  %v81_v6 = vld [vmem:[#allocation2 + $0x70] sm:$0xff] }
  0x3d   :  { %459 = vmatprep.subr.bf16.mxu0 %v3115_v7  ;;  %v3123_v11 = vcombine.high %v83_v8, %v87_v9  ;;  %v91_v12 = vld [vmem:[#allocation2 + $0xc0] sm:$0xff]  ;;  %v3122_v21 = vcombine.low %v83_v8, %v87_v9  ;;  %502 = vmatprep.subr.bf16.mxu1 %v3117_v22  ;;  %v3125_v28 = vcombine.high %v84_v20, %v88_v23  ;;  %v92_v29 = vld [vmem:[#allocation2 + $0xc8] sm:$0xff]  ;;  %v70_v7 = vld [vmem:[#allocation2 + $0x18] sm:$0xff] }
  0x3e   :  { %v95_v15 = vld [vmem:[#allocation2 + $0xe0] sm:$0xff]  ;;  %v96_v30 = vld [vmem:[#allocation2 + $0xe8] sm:$0xff]  ;;  %v3124_v33 = vcombine.low %v84_v20, %v88_v23  ;;  %v74_v8 = vld [vmem:[#allocation2 + $0x38] sm:$0xff]  ;;  %v3110_v9 = vcombine.low %v69_v58, %v73_v60  ;;  %v3118_v17 = vcombine.low %v77_v4, %v81_v6 }
  0x3f   :  { %v3131_v24 = vcombine.high %v91_v12, %v95_v15  ;;  %v99_v26 = vld [vmem:[#allocation2 + $0x100] sm:$0xff]  ;;  %v3130_v31 = vcombine.low %v91_v12, %v95_v15  ;;  %v3133_v36 = vcombine.high %v92_v29, %v96_v30  ;;  %v100_v37 = vld [vmem:[#allocation2 + $0x108] sm:$0xff]  ;;  %v3132_v41 = vcombine.low %v92_v29, %v96_v30  ;;  %v78_v15 = vld [vmem:[#allocation2 + $0x58] sm:$0xff] }
  0x40   :  { %460 = vmatpush1.bf16.msra.mxu0 %v3114_v10  ;;  %v103_v27 = vld [vmem:[#allocation2 + $0x120] sm:$0xff]  ;;  %503 = vmatpush1.bf16.msra.mxu1 %v3116_v25  ;;  %v104_v38 = vld [vmem:[#allocation2 + $0x128] sm:$0xff]  ;;  %v85_v10 = vld [vmem:[#allocation2 + $0x90] sm:$0xff]  ;;  %v3119_v12 = vcombine.high %v77_v4, %v81_v6  ;;  %v3113_v14 = vcombine.high %v70_v7, %v74_v8 }
  0x41   :  { %461 = vmatprep.subr.bf16.mxu0 %v3123_v11  ;;  %v3139_v32 = vcombine.high %v99_v26, %v103_v27  ;;  %v107_v34 = vld [vmem:[#allocation2 + $0x140] sm:$0xff]  ;;  %504 = vmatprep.subr.bf16.mxu1 %v3125_v28  ;;  %v3138_v39 = vcombine.low %v99_v26, %v103_v27  ;;  %v3141_v44 = vcombine.high %v100_v37, %v104_v38  ;;  %v108_v45 = vld [vmem:[#allocation2 + $0x148] sm:$0xff]  ;;  %v82_v16 = vld [vmem:[#allocation2 + $0x78] sm:$0xff] }
  0x42   :  { %v111_v35 = vld [vmem:[#allocation2 + $0x160] sm:$0xff]  ;;  %v112_v46 = vld [vmem:[#allocation2 + $0x168] sm:$0xff]  ;;  %v3140_v50 = vcombine.low %v100_v37, %v104_v38  ;;  %v3127_v18 = vcombine.high %v85_v10, %v89_v13  ;;  %v93_v19 = vld [vmem:[#allocation2 + $0xd0] sm:$0xff]  ;;  %v3121_v22 = vcombine.high %v78_v15, %v82_v16  ;;  %v3126_v25 = vcombine.low %v85_v10, %v89_v13 }
  0x43   :  { %v3147_v40 = vcombine.high %v107_v34, %v111_v35  ;;  %v115_v42 = vld [vmem:[#allocation2 + $0x180] sm:$0xff]  ;;  %v3146_v47 = vcombine.low %v107_v34, %v111_v35  ;;  %v3149_v52 = vcombine.high %v108_v45, %v112_v46  ;;  %v116_v53 = vld [vmem:[#allocation2 + $0x188] sm:$0xff]  ;;  %v3148_v57 = vcombine.low %v108_v45, %v112_v46  ;;  %v97_v20 = vld [vmem:[#allocation2 + $0xf0] sm:$0xff] }
  0x44   :  { %462 = vmatpush1.bf16.msra.mxu0 %v3122_v21  ;;  %505 = vmatpush1.bf16.msra.mxu1 %v3124_v33  ;;  %v119_v43 = vld [vmem:[#allocation2 + $0x1a0] sm:$0xff]  ;;  %v120_v54 = vld [vmem:[#allocation2 + $0x1a8] sm:$0xff]  ;;  %v3112_v21 = vcombine.low %v70_v7, %v74_v8  ;;  %v86_v23 = vld [vmem:[#allocation2 + $0x98] sm:$0xff]  ;;  %v3135_v27 = vcombine.high %v93_v19, %v97_v20  ;;  %v3120_v29 = vcombine.low %v78_v15, %v82_v16 }
  0x45   :  { %463 = vmatprep.subr.bf16.mxu0 %v3131_v24  ;;  %506 = vmatprep.subr.bf16.mxu1 %v3133_v36  ;;  %v3155_v48 = vcombine.high %v115_v42, %v119_v43  ;;  %v123_v49 = vld [vmem:[#allocation2 + $0x1c0] sm:$0xff]  ;;  %v3154_v55 = vcombine.low %v115_v42, %v119_v43  ;;  %v3157_v59 = vcombine.high %v116_v53, %v120_v54  ;;  %v124_v61 = vld [vmem:[#allocation2 + $0x1c8] sm:$0xff]  ;;  %v90_v24 = vld [vmem:[#allocation2 + $0xb8] sm:$0xff] }
  0x46   :  { %v127_v51 = vld [vmem:[#allocation2 + $0x1e0] sm:$0xff]  ;;  %v128_v62 = vld [vmem:[#allocation2 + $0x1e8] sm:$0xff]  ;;  %v3156_v2 = vcombine.low %v116_v53, %v120_v54  ;;  %v101_v26 = vld [vmem:[#allocation2 + $0x110] sm:$0xff]  ;;  %v3129_v30 = vcombine.high %v86_v23, %v90_v24  ;;  %v3134_v33 = vcombine.low %v93_v19, %v97_v20  ;;  %v3128_v37 = vcombine.low %v86_v23, %v90_v24 }
  0x47   :  { %v3163_v56 = vcombine.high %v123_v49, %v127_v51  ;;  %v3162_v63 = vcombine.low %v123_v49, %v127_v51  ;;  %v4244_v1 = vld [vmem:[%s4357_s0] sm:$0xff]   ;;  %v3165_v5 = vcombine.high %v124_v61, %v128_v62  ;;  %v3164_v11 = vcombine.low %v124_v61, %v128_v62  ;;  %v105_v28 = vld [vmem:[#allocation2 + $0x130] sm:$0xff]  ;;  %v102_v38 = vld [vmem:[#allocation2 + $0x118] sm:$0xff] }
  0x48   :  { %464 = vmatpush1.bf16.msra.mxu0 %v3130_v31  ;;  %507 = vmatpush1.bf16.msra.mxu1 %v3132_v41  ;;  %v94_v31 = vld [vmem:[#allocation2 + $0xd8] sm:$0xff]  ;;  %v109_v34 = vld [vmem:[#allocation2 + $0x150] sm:$0xff]  ;;  %v3143_v36 = vcombine.high %v101_v26, %v105_v28  ;;  %v3142_v41 = vcombine.low %v101_v26, %v105_v28  ;;  %v3703_v4 = vld [vmem:[#allocation4] ss:$12 sps:$4 sm:$0xff]  }
  0x49   :  { %465 = vmatprep.subr.bf16.mxu0 %v3139_v32  ;;  %508 = vmatprep.subr.bf16.mxu1 %v3141_v44  ;;  %v98_v32 = vld [vmem:[#allocation2 + $0xf8] sm:$0xff]  ;;  %v113_v35 = vld [vmem:[#allocation2 + $0x170] sm:$0xff]  ;;  %v3715_v20 = vld [vmem:[#allocation4 + $0x60] ss:$12 sps:$4 sm:$0xff]  }
  0x4a   :  { %v117_v42 = vld [vmem:[#allocation2 + $0x190] sm:$0xff]  ;;  %v3151_v44 = vcombine.high %v109_v34, %v113_v35  ;;  %v110_v45 = vld [vmem:[#allocation2 + $0x158] sm:$0xff]  ;;  %v3727_v28 = vld [vmem:[#allocation4 + $0xc0] ss:$12 sps:$4 sm:$0xff]  }
  0x4b   :  { %v121_v43 = vld [vmem:[#allocation2 + $0x1b0] sm:$0xff]  ;;  %v114_v46 = vld [vmem:[#allocation2 + $0x178] sm:$0xff] }
  0x4c   :  { %466 = vmatpush1.bf16.msra.mxu0 %v3138_v39  ;;  %509 = vmatpush1.bf16.msra.mxu1 %v3140_v50  ;;  %v3137_v39 = vcombine.high %v94_v31, %v98_v32  ;;  %v125_v49 = vld [vmem:[#allocation2 + $0x1d0] sm:$0xff]  ;;  %v3159_v51 = vcombine.high %v117_v42, %v121_v43  ;;  %v118_v53 = vld [vmem:[#allocation2 + $0x198] sm:$0xff]  ;;  %v3152_v58 = vcombine.low %v110_v45, %v114_v46 }
  0x4d   :  { %467 = vmatprep.subr.bf16.mxu0 %v3147_v40  ;;  %510 = vmatprep.subr.bf16.mxu1 %v3149_v52  ;;  %v106_v40 = vld [vmem:[#allocation2 + $0x138] sm:$0xff]  ;;  %v129_v50 = vld [vmem:[#allocation2 + $0x1f0] sm:$0xff] }
  0x4e   :  { %v3144_v52 = vcombine.low %v102_v38, %v106_v40  ;;  %v122_v54 = vld [vmem:[#allocation2 + $0x1b8] sm:$0xff]  ;;  %v3705_v62 = vld [vmem:[#allocation4 + $0x4] ss:$12 sps:$4 sm:$0xff]   ;;  %v3730_v6 = vld [vmem:[#allocation4 + $0xc8] ss:$12 sps:$4 sm:$0xff]  }
  0x4f   :  { %v130_v60 = vld [vmem:[#allocation2 + $0x1f8] sm:$0xff]  ;;  %v3161_v61 = vcombine.high %v118_v53, %v122_v54  ;;  %v3731_v10 = vld [vmem:[#allocation4 + $0x8] ss:$12 sps:$4 sm:$0xff]  }
  0x50   :  { %468 = vmatpush1.bf16.msra.mxu0 %v3146_v47  ;;  %511 = vmatpush1.bf16.msra.mxu1 %v3148_v57  ;;  %v3145_v47 = vcombine.high %v102_v38, %v106_v40  ;;  %v3167_v57 = vcombine.high %v125_v49, %v129_v50  ;;  %v3706_v8 = vld [vmem:[#allocation4 + $0x18] ss:$12 sps:$4 sm:$0xff]   ;;  %v3712_v16 = vld [vmem:[#allocation4 + $0x48] ss:$12 sps:$4 sm:$0xff]   ;;  %v3745_v19 = vld [vmem:[#allocation4 + $0x110] ss:$12 sps:$4 sm:$0xff]  }
  0x51   :  { %469 = vmatprep.subr.bf16.mxu0 %v3155_v48  ;;  %512 = vmatprep.subr.bf16.mxu1 %v3157_v59  ;;  %v3150_v48 = vcombine.low %v109_v34, %v113_v35  ;;  %v126_v59 = vld [vmem:[#allocation2 + $0x1d8] sm:$0xff]  ;;  %v3723_v23 = vld [vmem:[#allocation4 + $0x94] ss:$12 sps:$4 sm:$0xff]   ;;  %v3749_v35 = vld [vmem:[#allocation4 + $0x124] ss:$12 sps:$4 sm:$0xff]  }
  0x52   :  { %v3168_v7 = vcombine.low %v126_v59, %v130_v60  ;;  %v3714_v13 = vld [vmem:[#allocation4 + $0x4c] ss:$12 sps:$4 sm:$0xff]   ;;  %v3721_v24 = vld [vmem:[#allocation4 + $0x90] ss:$12 sps:$4 sm:$0xff]   ;;  %v3724_v26 = vld [vmem:[#allocation4 + $0xa8] ss:$12 sps:$4 sm:$0xff]  }
  0x53   :  { %v3740_v15 = vld [vmem:[#allocation4 + $0xf8] ss:$12 sps:$4 sm:$0xff]   ;;  %v3742_v34 = vld [vmem:[#allocation4 + $0x108] ss:$12 sps:$4 sm:$0xff]   ;;  %v3755_v40 = vld [vmem:[#allocation4 + $0x140] ss:$12 sps:$4 sm:$0xff]  }
  0x54   :  { %470 = vmatpush1.bf16.msra.mxu0 %v3154_v55  ;;  %513 = vmatpush1.bf16.msra.mxu1 %v3156_v2  ;;  %v3153_v55 = vcombine.high %v110_v45, %v114_v46  ;;  %v3160_v2 = vcombine.low %v118_v53, %v122_v54  ;;  %v3751_v38 = vld [vmem:[#allocation4 + $0x68] ss:$12 sps:$4 sm:$0xff]   ;;  %v3761_v45 = vld [vmem:[#allocation4 + $0x98] ss:$12 sps:$4 sm:$0xff]  }
  0x55   :  { %471 = vmatprep.subr.bf16.mxu0 %v3163_v56  ;;  %514 = vmatprep.subr.bf16.mxu1 %v3165_v5  ;;  %v3158_v56 = vcombine.low %v117_v42, %v121_v43  ;;  %v3708_v5 = vld [vmem:[#allocation4 + $0x1c] ss:$12 sps:$4 sm:$0xff]   ;;  %v3756_v42 = vld [vmem:[#allocation4 + $0x80] ss:$12 sps:$4 sm:$0xff]  }
  0x56   :  { %v3759_v43 = vld [vmem:[#allocation4 + $0x154] ss:$12 sps:$4 sm:$0xff]   ;;  %v3764_v46 = vld [vmem:[#allocation4 + $0x16c] ss:$12 sps:$4 sm:$0xff]  }
  0x58   :  { %472 = vmatpush1.bf16.msra.mxu0 %v3162_v63  ;;  %515 = vmatpush1.bf16.msra.mxu1 %v3164_v11  ;;  %v3166_v63 = vcombine.low %v125_v49, %v129_v50  ;;  %v3735_v11 = vld [vmem:[#allocation4 + $0xe0] ss:$12 sps:$4 sm:$0xff]   ;;  %v3766_v49 = vld [vmem:[#allocation4 + $0xb0] ss:$12 sps:$4 sm:$0xff]  }
  0x59   :  { %543 = vmatprep.subr.bf16.mxu0 %v3111_v3  ;;  %586 = vmatprep.subr.bf16.mxu1 %v3113_v14  ;;  %v3169_v3 = vcombine.high %v126_v59, %v130_v60  ;;  %v3736_v14 = vld [vmem:[#allocation4 + $0x20] ss:$12 sps:$4 sm:$0xff]   ;;  %v3769_v50 = vld [vmem:[#allocation4 + $0x184] ss:$12 sps:$4 sm:$0xff]  }
  0x5b   :  { %490 = vmatmul.mubr.bf16.vlgmr.msra.gmra.mrb[0].mxu0 %v4244_v1  ;;  %533 = vmatmul.mubr.bf16.vlgmr.msra.gmra.mrb[0].mxu1 %v4244_v1 }
  0x5c   :  { %544 = vmatpush1.bf16.msra.mxu0 %v3110_v9  ;;  %575 = vmatprep.mubr.bf16.mxu0 %v4170_v0  ;;  %v3711_v9 = vld [vmem:[#allocation4 + $0x34] ss:$12 sps:$4 sm:$0xff]  }
  0x5d   :  { %545 = vmatprep.subr.bf16.mxu0 %v3119_v12  ;;  %587 = vmatpush1.bf16.msra.mxu1 %v3112_v21  ;;  %v3709_v12 = vld [vmem:[#allocation4 + $0x30] ss:$12 sps:$4 sm:$0xff]  }
  0x5e   :  { %588 = vmatprep.subr.bf16.mxu1 %v3121_v22  ;;  %618 = vmatprep.mubr.bf16.mxu1 %v4170_v0  ;;  %v3136_v0 = vcombine.low %v94_v31, %v98_v32  ;;  %v3720_v21 = vld [vmem:[#allocation4 + $0x7c] ss:$12 sps:$4 sm:$0xff]   ;;  %v3739_v31 = vld [vmem:[#allocation4 + $0xf4] ss:$12 sps:$4 sm:$0xff]  }
  0x5f   :  { %v3746_v22 = vld [vmem:[#allocation4 + $0x50] ss:$12 sps:$4 sm:$0xff]  }
  0x60   :  { %546 = vmatpush1.bf16.msra.mxu0 %v3118_v17  ;;  %v3717_v17 = vld [vmem:[#allocation4 + $0x64] ss:$12 sps:$4 sm:$0xff]  }
  0x61   :  { %547 = vmatprep.subr.bf16.mxu0 %v3127_v18  ;;  %589 = vmatpush1.bf16.msra.mxu1 %v3120_v29  ;;  %v3741_v18 = vld [vmem:[#allocation4 + $0x38] ss:$12 sps:$4 sm:$0xff]   ;;  %v3734_v29 = vld [vmem:[#allocation4 + $0xdc] ss:$12 sps:$4 sm:$0xff]  }
  0x62   :  { %590 = vmatprep.subr.bf16.mxu1 %v3129_v30  ;;  %v3732_v30 = vld [vmem:[#allocation4 + $0xd8] ss:$12 sps:$4 sm:$0xff]   ;;  %v3737_v32 = vld [vmem:[#allocation4 + $0xf0] ss:$12 sps:$4 sm:$0xff]  }
  0x64   :  { %548 = vmatpush1.bf16.msra.mxu0 %v3126_v25  ;;  %v3726_v25 = vld [vmem:[#allocation4 + $0xac] ss:$12 sps:$4 sm:$0xff]  }
  0x65   :  { %549 = vmatprep.subr.bf16.mxu0 %v3135_v27  ;;  %591 = vmatpush1.bf16.msra.mxu1 %v3128_v37  ;;  %v3729_v27 = vld [vmem:[#allocation4 + $0xc4] ss:$12 sps:$4 sm:$0xff]   ;;  %v3747_v37 = vld [vmem:[#allocation4 + $0x120] ss:$12 sps:$4 sm:$0xff]  }
  0x66   :  { %592 = vmatprep.subr.bf16.mxu1 %v3137_v39  ;;  %v3754_v39 = vld [vmem:[#allocation4 + $0x13c] ss:$12 sps:$4 sm:$0xff]  }
  0x68   :  { %550 = vmatpush1.bf16.msra.mxu0 %v3134_v33  ;;  %v3744_v33 = vld [vmem:[#allocation4 + $0x10c] ss:$12 sps:$4 sm:$0xff]  }
  0x69   :  { %551 = vmatprep.subr.bf16.mxu0 %v3143_v36  ;;  %593 = vmatpush1.bf16.msra.mxu1 %v3136_v0  ;;  %v3750_v36 = vld [vmem:[#allocation4 + $0x128] ss:$12 sps:$4 sm:$0xff]   ;;  %v3757_v0 = vld [vmem:[#allocation4 + $0x150] ss:$12 sps:$4 sm:$0xff]  }
  0x6a   :  { %594 = vmatprep.subr.bf16.mxu1 %v3145_v47  ;;  %v3765_v47 = vld [vmem:[#allocation4 + $0x170] ss:$12 sps:$4 sm:$0xff]  }
  0x6c   :  { %552 = vmatpush1.bf16.msra.mxu0 %v3142_v41  ;;  %v3752_v41 = vld [vmem:[#allocation4 + $0x138] ss:$12 sps:$4 sm:$0xff]  }
  0x6d   :  { %553 = vmatprep.subr.bf16.mxu0 %v3151_v44  ;;  %595 = vmatpush1.bf16.msra.mxu1 %v3144_v52  ;;  %v3760_v44 = vld [vmem:[#allocation4 + $0x158] ss:$12 sps:$4 sm:$0xff]  }
  0x6e   :  { %596 = vmatprep.subr.bf16.mxu1 %v3153_v55 }
  0x70   :  { %554 = vmatpush1.bf16.msra.mxu0 %v3150_v48  ;;  %v3762_v48 = vld [vmem:[#allocation4 + $0x168] ss:$12 sps:$4 sm:$0xff]  }
  0x71   :  { %555 = vmatprep.subr.bf16.mxu0 %v3159_v51  ;;  %597 = vmatpush1.bf16.msra.mxu1 %v3152_v58  ;;  %v3770_v51 = vld [vmem:[#allocation4 + $0x248] ss:$12 sps:$4 sm:$0xff]  }
  0x72   :  { %598 = vmatprep.subr.bf16.mxu1 %v3161_v61 }
  0x74   :  { %556 = vmatpush1.bf16.msra.mxu0 %v3158_v56 }
  0x75   :  { %557 = vmatprep.subr.bf16.mxu0 %v3167_v57  ;;  %599 = vmatpush1.bf16.msra.mxu1 %v3160_v2 }
  0x76   :  { %600 = vmatprep.subr.bf16.mxu1 %v3169_v3 }
  0x78   :  { %558 = vmatpush1.bf16.msra.mxu0 %v3166_v63 }
  0x79   :  { %1305 = vmatprep.subr.bf16.mxu0 %v3705_v62  ;;  %601 = vmatpush1.bf16.msra.mxu1 %v3168_v7  ;;  %v3774_v7 = vld [vmem:[#allocation4 + $0x19c] ss:$12 sps:$4 sm:$0xff]  }
  0x7a   :  { %3426 = vmatprep.subr.bf16.mxu1 %v3730_v6 }
  0x7b   :  { %576 = vmatmul.mubr.bf16.vlgmr.msra.gmra.mrb[4].mxu0 %v4244_v1 }
  0x7c   :  { %1306 = vmatpush1.bf16.msra.mxu0 %v3703_v4  ;;  %619 = vmatmul.mubr.bf16.vlgmr.msra.gmra.mrb[4].mxu1 %v4244_v1  ;;  %v3718_v1 = vld [vmem:[#allocation4 + $0x78] ss:$12 sps:$4 sm:$0xff]   ;;  %v3767_v4 = vld [vmem:[#allocation4 + $0x180] ss:$12 sps:$4 sm:$0xff]  }
  0x7d   :  { %1307 = vmatprep.subr.bf16.mxu0 %v3708_v5  ;;  %3427 = vmatpush3.bf16.msra.mxu1 %v3731_v10  ;;  %v3771_v5 = vld [vmem:[#allocation4 + $0x188] ss:$12 sps:$4 sm:$0xff]  }
  0x7e   :  { %3428 = vmatprep.subr.bf16.mxu1 %v3735_v11 }
  0x80   :  { %1308 = vmatpush1.bf16.msra.mxu0 %v3706_v8  ;;  %v3775_v8 = vld [vmem:[#allocation4 + $0x260] ss:$12 sps:$4 sm:$0xff]  }
  0x81   :  { %1309 = vmatprep.subr.bf16.mxu0 %v3711_v9  ;;  %3429 = vmatpush3.bf16.msra.mxu1 %v3736_v14 }
  0x82   :  { %3430 = vmatprep.subr.bf16.mxu1 %v3740_v15  ;;  %v3779_v15 = vld [vmem:[#allocation4 + $0x1b4] ss:$12 sps:$4 sm:$0xff]  }
  0x84   :  { %1310 = vmatpush1.bf16.msra.mxu0 %v3709_v12  ;;  %v3772_v12 = vld [vmem:[#allocation4 + $0x198] ss:$12 sps:$4 sm:$0xff]  }
  0x85   :  { %1311 = vmatprep.subr.bf16.mxu0 %v3714_v13  ;;  %3431 = vmatpush3.bf16.msra.mxu1 %v3741_v18  ;;  %v3776_v13 = vld [vmem:[#allocation4 + $0x1a0] ss:$12 sps:$4 sm:$0xff]   ;;  %v3777_v18 = vld [vmem:[#allocation4 + $0x1b0] ss:$12 sps:$4 sm:$0xff]  }
  0x86   :  { %3432 = vmatprep.subr.bf16.mxu1 %v3745_v19  ;;  %v3781_v19 = vld [vmem:[#allocation4 + $0x1b8] ss:$12 sps:$4 sm:$0xff]  }
  0x88   :  { %1312 = vmatpush1.bf16.msra.mxu0 %v3712_v16  ;;  %v3780_v16 = vld [vmem:[#allocation4 + $0x278] ss:$12 sps:$4 sm:$0xff]  }
  0x89   :  { %1313 = vmatprep.subr.bf16.mxu0 %v3717_v17  ;;  %3433 = vmatpush3.bf16.msra.mxu1 %v3746_v22  ;;  %v3782_v22 = vld [vmem:[#allocation4 + $0x1c8] ss:$12 sps:$4 sm:$0xff]  }
  0x8a   :  { %3434 = vmatprep.subr.bf16.mxu1 %v3750_v36  ;;  %v3800_v36 = vld [vmem:[#allocation4 + $0x2d8] ss:$12 sps:$4 sm:$0xff]  }
  0x8c   :  { %1314 = vmatpush1.bf16.msra.mxu0 %v3715_v20  ;;  %v3784_v20 = vld [vmem:[#allocation4 + $0x1cc] ss:$12 sps:$4 sm:$0xff]  }
  0x8d   :  { %1315 = vmatprep.subr.bf16.mxu0 %v3720_v21  ;;  %3435 = vmatpush3.bf16.msra.mxu1 %v3751_v38  ;;  %v3785_v21 = vld [vmem:[#allocation4 + $0x290] ss:$12 sps:$4 sm:$0xff]  }
  0x8e   :  { %3436 = vmatprep.subr.bf16.mxu1 %v3755_v40  ;;  %v3801_v40 = vld [vmem:[#allocation4 + $0x218] ss:$12 sps:$4 sm:$0xff]  }
  0x90   :  { %1316 = vmatpush1.bf16.msra.mxu0 %v3718_v1  ;;  %v3786_v1 = vld [vmem:[#allocation4 + $0x1d0] ss:$12 sps:$4 sm:$0xff]  }
  0x91   :  { %1317 = vmatprep.subr.bf16.mxu0 %v3723_v23  ;;  %3437 = vmatpush3.bf16.msra.mxu1 %v3756_v42  ;;  %v3789_v23 = vld [vmem:[#allocation4 + $0x1e4] ss:$12 sps:$4 sm:$0xff]   ;;  %v3804_v42 = vld [vmem:[#allocation4 + $0x22c] ss:$12 sps:$4 sm:$0xff]  }
  0x92   :  { %3438 = vmatprep.subr.bf16.mxu1 %v3760_v44 }
  0x94   :  { %1318 = vmatpush1.bf16.msra.mxu0 %v3721_v24  ;;  %v3790_v24 = vld [vmem:[#allocation4 + $0x2a8] ss:$12 sps:$4 sm:$0xff]  }
  0x95   :  { %1319 = vmatprep.subr.bf16.mxu0 %v3726_v25  ;;  %3439 = vmatpush3.bf16.msra.mxu1 %v3761_v45  ;;  %v3787_v25 = vld [vmem:[#allocation4 + $0x1e0] ss:$12 sps:$4 sm:$0xff]   ;;  %v3802_v45 = vld [vmem:[#allocation4 + $0x228] ss:$12 sps:$4 sm:$0xff]  }
  0x96   :  { %3440 = vmatprep.subr.bf16.mxu1 %v3765_v47 }
  0x98   :  { %1320 = vmatpush1.bf16.msra.mxu0 %v3724_v26  ;;  %v3791_v26 = vld [vmem:[#allocation4 + $0x1e8] ss:$12 sps:$4 sm:$0xff]  }
  0x99   :  { %1321 = vmatprep.subr.bf16.mxu0 %v3729_v27  ;;  %3441 = vmatpush3.bf16.msra.mxu1 %v3766_v49  ;;  %v3794_v27 = vld [vmem:[#allocation4 + $0x1fc] ss:$12 sps:$4 sm:$0xff]   ;;  %v3812_v49 = vld [vmem:[#allocation4 + $0x304] ss:$12 sps:$4 sm:$0xff]  }
  0x9a   :  { %3448 = vmatprep.subr.bf16.mxu1 %v3770_v51 }
  0x9c   :  { %1322 = vmatpush1.bf16.msra.mxu0 %v3727_v28  ;;  %v3795_v28 = vld [vmem:[#allocation4 + $0x2c0] ss:$12 sps:$4 sm:$0xff]  }
  0x9d   :  { %1323 = vmatprep.subr.bf16.mxu0 %v3734_v29 }
  0xa0   :  { %1324 = vmatpush1.bf16.msra.mxu0 %v3732_v30 }
  0xa1   :  { %1325 = vmatprep.subr.bf16.mxu0 %v3739_v31 }
  0xa4   :  { %1326 = vmatpush1.bf16.msra.mxu0 %v3737_v32  ;;  %v3792_v32 = vld [vmem:[#allocation4 + $0x1f8] ss:$12 sps:$4 sm:$0xff]  }
  0xa5   :  { %1327 = vmatprep.subr.bf16.mxu0 %v3744_v33  ;;  %v3796_v33 = vld [vmem:[#allocation4 + $0x200] ss:$12 sps:$4 sm:$0xff]  }
  0xa8   :  { %1328 = vmatpush1.bf16.msra.mxu0 %v3742_v34 }
  0xa9   :  { %1329 = vmatprep.subr.bf16.mxu0 %v3749_v35  ;;  %v3799_v35 = vld [vmem:[#allocation4 + $0x214] ss:$12 sps:$4 sm:$0xff]  }
  0xac   :  { %1330 = vmatpush1.bf16.msra.mxu0 %v3747_v37 }
  0xad   :  { %1331 = vmatprep.subr.bf16.mxu0 %v3754_v39  ;;  %v3797_v39 = vld [vmem:[#allocation4 + $0x210] ss:$12 sps:$4 sm:$0xff]  }
  0xb0   :  { %1332 = vmatpush1.bf16.msra.mxu0 %v3752_v41 }
  0xb1   :  { %1333 = vmatprep.subr.bf16.mxu0 %v3759_v43  ;;  %v3805_v43 = vld [vmem:[#allocation4 + $0x2f0] ss:$12 sps:$4 sm:$0xff]  }
  0xb4   :  { %1334 = vmatpush1.bf16.msra.mxu0 %v3757_v0 }
  0xb5   :  { %1335 = vmatprep.subr.bf16.mxu0 %v3764_v46  ;;  %v3806_v46 = vld [vmem:[#allocation4 + $0x230] ss:$12 sps:$4 sm:$0xff]  }
  0xb8   :  { %1336 = vmatpush1.bf16.msra.mxu0 %v3762_v48  ;;  %v3809_v48 = vld [vmem:[#allocation4 + $0x244] ss:$12 sps:$4 sm:$0xff]  }
  0xb9   :  { %1348 = vmatprep.subr.bf16.mxu0 %v3769_v50 }
 0x12e   :  { %v491_v52 = vpop.f32.mrb[0].mxu0  ;;  %v534_v56 = vpop.f32.mrb[0].mxu1 }
 0x12f   :  { %4023 = vtanh.f32 %v491_v52  ;;  %v493_v53 = vpop.f32.mrb[1].mxu0  ;;  %v536_v57 = vpop.f32.mrb[1].mxu1 }
 0x130   :  { %4025 = vtanh.f32 %v493_v53  ;;  %v495_v54 = vpop.f32.mrb[2].mxu0  ;;  %v538_v58 = vpop.f32.mrb[2].mxu1  ;;  %v3807_v53 = vld [vmem:[#allocation4 + $0x240] ss:$12 sps:$4 sm:$0xff]  }
 0x131   :  { %4027 = vtanh.f32 %v495_v54  ;;  %v497_v55 = vpop.f32.mrb[3].mxu0  ;;  %v540_v59 = vpop.f32.mrb[3].mxu1  ;;  %v3810_v54 = vld [vmem:[#allocation4 + $0x300] ss:$12 sps:$4 sm:$0xff]  }
 0x132   :  { %4029 = vtanh.f32 %v497_v55 }
 0x133   :  { %4031 = vtanh.f32 %v534_v56 }
 0x134   :  { %4033 = vtanh.f32 %v536_v57  ;;  %v3815_v57 = vld [vmem:[#allocation4 + $0x25c] ss:$12 sps:$4 sm:$0xff]  }
 0x135   :  { %4035 = vtanh.f32 %v538_v58  ;;  %v3818_v58 = vld [vmem:[#allocation4 + $0x31c] ss:$12 sps:$4 sm:$0xff]  }
 0x136   :  { %4037 = vtanh.f32 %v540_v59 }
 0x139   :  { %v4024_v60 = vpop.eup %4023 }
 0x13a   :  { %v4026_v61 = vpop.eup %4025 }
 0x13b   :  { %v4028_v62 = vpop.eup %4027 }
 0x13c   :  { %v4030_v63 = vpop.eup %4029  ;;  %v645_v2 = vpack.c.bf16 %v4028_v62, %v4024_v60  ;;  %v3813_v62 = vld [vmem:[#allocation4 + $0x258] ss:$12 sps:$4 sm:$0xff]  }
 0x13d   :  { %v646_v3 = vpack.c.bf16 %v4030_v63, %v4026_v61  ;;  %v4032_v6 = vpop.eup %4031  ;;  %v3816_v63 = vld [vmem:[#allocation4 + $0x318] ss:$12 sps:$4 sm:$0xff]  }
 0x13e   :  { %v4034_v9 = vpop.eup %4033 }
 0x13f   :  { %1337 = vmatprep.mubr.bf16.mxu0 %v646_v3  ;;  %1423 = vmatprep.mubr.bf16.mxu1 %v646_v3  ;;  %v4036_v10 = vpop.eup %4035  ;;  %v3821_v3 = vld [vmem:[#allocation4 + $0x274] ss:$12 sps:$4 sm:$0xff]  }
 0x140   :  { %1338 = vmatmul.mubr.bf16.vlgmr.msra.gmra.mrb[8].mxu0 %v645_v2  ;;  %1424 = vmatmul.mubr.bf16.vlgmr.msra.gmra.mrb[8].mxu1 %v645_v2  ;;  %v4038_v11 = vpop.eup %4037  ;;  %v4252_v14 = vpack.c.bf16 %v4036_v10, %v4032_v6  ;;  %v3819_v6 = vld [vmem:[#allocation4 + $0x270] ss:$12 sps:$4 sm:$0xff]   ;;  %v3825_v10 = vld [vmem:[#allocation4 + $0x288] ss:$12 sps:$4 sm:$0xff]  }
 0x141   :  { %1349 = vmatpush1.bf16.msra.mxu0 %v3767_v4  ;;  %3449 = vmatpush3.bf16.msra.mxu1 %v3771_v5  ;;  %v648_v17 = vpack.c.bf16 %v4038_v11, %v4034_v9  ;;  %v3824_v4 = vld [vmem:[#allocation4 + $0x334] ss:$12 sps:$4 sm:$0xff]   ;;  %v3830_v9 = vld [vmem:[#allocation4 + $0x34c] ss:$12 sps:$4 sm:$0xff]  }
 0x142   :  { %1350 = vmatprep.subr.bf16.mxu0 %v3774_v7  ;;  %3450 = vmatprep.subr.bf16.mxu1 %v3775_v8  ;;  %v3822_v7 = vld [vmem:[#allocation4 + $0x330] ss:$12 sps:$4 sm:$0xff]   ;;  %v3827_v8 = vld [vmem:[#allocation4 + $0x28c] ss:$12 sps:$4 sm:$0xff]   ;;  %v3828_v11 = vld [vmem:[#allocation4 + $0x348] ss:$12 sps:$4 sm:$0xff]  }
 0x143   :  { %1380 = vmatprep.mubr.bf16.mxu0 %v648_v17  ;;  %1464 = vmatprep.mubr.bf16.mxu1 %v648_v17  ;;  %v3839_v17 = vld [vmem:[#allocation4 + $0x2bc] ss:$12 sps:$4 sm:$0xff]  }
 0x145   :  { %1351 = vmatpush1.bf16.msra.mxu0 %v3772_v12  ;;  %3451 = vmatpush3.bf16.msra.mxu1 %v3776_v13  ;;  %v3833_v12 = vld [vmem:[#allocation4 + $0x2a4] ss:$12 sps:$4 sm:$0xff]  }
 0x146   :  { %1352 = vmatprep.subr.bf16.mxu0 %v3779_v15  ;;  %3452 = vmatprep.subr.bf16.mxu1 %v3780_v16  ;;  %v3836_v13 = vld [vmem:[#allocation4 + $0x364] ss:$12 sps:$4 sm:$0xff]   ;;  %v3831_v15 = vld [vmem:[#allocation4 + $0x2a0] ss:$12 sps:$4 sm:$0xff]  }
 0x147   :  { %v3834_v16 = vld [vmem:[#allocation4 + $0x360] ss:$12 sps:$4 sm:$0xff]  }
 0x149   :  { %1353 = vmatpush1.bf16.msra.mxu0 %v3777_v18  ;;  %3453 = vmatpush3.bf16.msra.mxu1 %v3781_v19  ;;  %v3842_v18 = vld [vmem:[#allocation4 + $0x37c] ss:$12 sps:$4 sm:$0xff]   ;;  %v3837_v19 = vld [vmem:[#allocation4 + $0x2b8] ss:$12 sps:$4 sm:$0xff]  }
 0x14a   :  { %1354 = vmatprep.subr.bf16.mxu0 %v3784_v20  ;;  %3454 = vmatprep.subr.bf16.mxu1 %v3785_v21  ;;  %v3840_v20 = vld [vmem:[#allocation4 + $0x378] ss:$12 sps:$4 sm:$0xff]   ;;  %v3845_v21 = vld [vmem:[#allocation4 + $0x2d4] ss:$12 sps:$4 sm:$0xff]  }
 0x14d   :  { %1355 = vmatpush1.bf16.msra.mxu0 %v3782_v22  ;;  %3455 = vmatpush3.bf16.msra.mxu1 %v3786_v1  ;;  %v3848_v22 = vld [vmem:[#allocation4 + $0x394] ss:$12 sps:$4 sm:$0xff]   ;;  %v3843_v1 = vld [vmem:[#allocation4 + $0x2d0] ss:$12 sps:$4 sm:$0xff]  }
 0x14e   :  { %1356 = vmatprep.subr.bf16.mxu0 %v3789_v23  ;;  %3456 = vmatprep.subr.bf16.mxu1 %v3790_v24  ;;  %v577_v29 = vpop.f32.mrb[4].mxu0  ;;  %v3846_v23 = vld [vmem:[#allocation4 + $0x390] ss:$12 sps:$4 sm:$0xff]   ;;  %v3851_v24 = vld [vmem:[#allocation4 + $0x2ec] ss:$12 sps:$4 sm:$0xff]  }
 0x14f   :  { %4039 = vtanh.f32 %v577_v29  ;;  %v579_v30 = vpop.f32.mrb[5].mxu0  ;;  %v620_v37 = vpop.f32.mrb[4].mxu1  ;;  %v3858_v29 = vld [vmem:[#allocation4 + $0x3c8] ss:$12 sps:$4 sm:$0xff]  }
 0x150   :  { %4041 = vtanh.f32 %v579_v30  ;;  %v581_v31 = vpop.f32.mrb[6].mxu0  ;;  %v622_v38 = vpop.f32.mrb[5].mxu1  ;;  %v3855_v30 = vld [vmem:[#allocation4 + $0x3c0] ss:$12 sps:$4 sm:$0xff]  }
 0x151   :  { %1357 = vmatpush1.bf16.msra.mxu0 %v3787_v25  ;;  %3457 = vmatpush3.bf16.msra.mxu1 %v3791_v26  ;;  %4043 = vtanh.f32 %v581_v31  ;;  %v583_v34 = vpop.f32.mrb[7].mxu0  ;;  %v624_v41 = vpop.f32.mrb[6].mxu1  ;;  %v3854_v25 = vld [vmem:[#allocation4 + $0x3ac] ss:$12 sps:$4 sm:$0xff]   ;;  %v3849_v26 = vld [vmem:[#allocation4 + $0x2e8] ss:$12 sps:$4 sm:$0xff]  }
 0x152   :  { %1358 = vmatprep.subr.bf16.mxu0 %v3794_v27  ;;  %3458 = vmatprep.subr.bf16.mxu1 %v3795_v28  ;;  %4045 = vtanh.f32 %v583_v34  ;;  %v626_v44 = vpop.f32.mrb[7].mxu1  ;;  %v3852_v27 = vld [vmem:[#allocation4 + $0x3a8] ss:$12 sps:$4 sm:$0xff]   ;;  %v3857_v28 = vld [vmem:[#allocation4 + $0x3c4] ss:$12 sps:$4 sm:$0xff]  }
 0x153   :  { %4047 = vtanh.f32 %v620_v37  ;;  %v3859_v31 = vld [vmem:[#allocation4 + $0x308] ss:$12 sps:$4 sm:$0xff]   ;;  %v3860_v34 = vld [vmem:[#allocation4 + $0x3d8] ss:$12 sps:$4 sm:$0xff]  }
 0x154   :  { %4049 = vtanh.f32 %v622_v38  ;;  %v3868_v37 = vld [vmem:[#allocation4 + $0x3f8] ss:$12 sps:$4 sm:$0xff]   ;;  %v3865_v38 = vld [vmem:[#allocation4 + $0x3f0] ss:$12 sps:$4 sm:$0xff]  }
 0x155   :  { %1359 = vmatpush1.bf16.msra.mxu0 %v3792_v32  ;;  %3459 = vmatpush3.bf16.msra.mxu1 %v3796_v33  ;;  %4051 = vtanh.f32 %v624_v41  ;;  %v3862_v32 = vld [vmem:[#allocation4 + $0x3dc] ss:$12 sps:$4 sm:$0xff]   ;;  %v3863_v33 = vld [vmem:[#allocation4 + $0x3e0] ss:$12 sps:$4 sm:$0xff]  }
 0x156   :  { %1360 = vmatprep.subr.bf16.mxu0 %v3799_v35  ;;  %3460 = vmatprep.subr.bf16.mxu1 %v3800_v36  ;;  %4053 = vtanh.f32 %v626_v44  ;;  %v3864_v35 = vld [vmem:[#allocation4 + $0x320] ss:$12 sps:$4 sm:$0xff]   ;;  %v3873_v41 = vld [vmem:[#allocation4 + $0x410] ss:$12 sps:$4 sm:$0xff]   ;;  %v3878_v44 = vld [vmem:[#allocation4 + $0x428] ss:$12 sps:$4 sm:$0xff]  }
 0x157   :  { %v3867_v36 = vld [vmem:[#allocation4 + $0x3f4] ss:$12 sps:$4 sm:$0xff]  }
 0x159   :  { %v4040_v0 = vpop.eup %4039  ;;  %1361 = vmatpush1.bf16.msra.mxu0 %v3797_v39  ;;  %3461 = vmatpush3.bf16.msra.mxu1 %v3801_v40  ;;  %v3869_v39 = vld [vmem:[#allocation4 + $0x338] ss:$12 sps:$4 sm:$0xff]  }
 0x15a   :  { %v4042_v47 = vpop.eup %4041  ;;  %1362 = vmatprep.subr.bf16.mxu0 %v3804_v42  ;;  %3462 = vmatprep.subr.bf16.mxu1 %v3805_v43  ;;  %v3872_v40 = vld [vmem:[#allocation4 + $0x40c] ss:$12 sps:$4 sm:$0xff]   ;;  %v3874_v42 = vld [vmem:[#allocation4 + $0x350] ss:$12 sps:$4 sm:$0xff]  }
 0x15b   :  { %v4044_v50 = vpop.eup %4043  ;;  %v3877_v43 = vld [vmem:[#allocation4 + $0x424] ss:$12 sps:$4 sm:$0xff]  }
 0x15c   :  { %v4046_v51 = vpop.eup %4045  ;;  %v4254_v52 = vpack.c.bf16 %v4044_v50, %v4040_v0  ;;  %v3875_v0 = vld [vmem:[#allocation4 + $0x420] ss:$12 sps:$4 sm:$0xff]  }
 0x15d   :  { %1363 = vmatpush1.bf16.msra.mxu0 %v3802_v45  ;;  %3463 = vmatpush3.bf16.msra.mxu1 %v3806_v46  ;;  %v4256_v55 = vpack.c.bf16 %v4046_v51, %v4042_v47  ;;  %v4048_v56 = vpop.eup %4047  ;;  %v3879_v45 = vld [vmem:[#allocation4 + $0x368] ss:$12 sps:$4 sm:$0xff]   ;;  %v3883_v47 = vld [vmem:[#allocation4 + $0x440] ss:$12 sps:$4 sm:$0xff]   ;;  %v3888_v51 = vld [vmem:[#allocation4 + $0x458] ss:$12 sps:$4 sm:$0xff]  }
 0x15e   :  { %1364 = vmatprep.subr.bf16.mxu0 %v3809_v48  ;;  %2132 = vmatprep.subr.bf16.mxu1 %v3812_v49  ;;  %v4050_v59 = vpop.eup %4049  ;;  %v3882_v46 = vld [vmem:[#allocation4 + $0x43c] ss:$12 sps:$4 sm:$0xff]   ;;  %v3880_v48 = vld [vmem:[#allocation4 + $0x438] ss:$12 sps:$4 sm:$0xff]   ;;  %v3884_v49 = vld [vmem:[#allocation4 + $0x380] ss:$12 sps:$4 sm:$0xff]  }
 0x15f   :  { %v4052_v60 = vpop.eup %4051  ;;  %v3887_v50 = vld [vmem:[#allocation4 + $0x454] ss:$12 sps:$4 sm:$0xff]  }
 0x160   :  { %1465 = vmatmul.mubr.bf16.vlgmr.msra.gmra.mrb[12].mxu1 %v4252_v14  ;;  %v4054_v61 = vpop.eup %4053  ;;  %v4259_v2 = vpack.c.bf16 %v4052_v60, %v4048_v56  ;;  %v3893_v56 = vld [vmem:[#allocation4 + $0x470] ss:$12 sps:$4 sm:$0xff]   ;;  %v3898_v60 = vld [vmem:[#allocation4 + $0x548] ss:$12 sps:$4 sm:$0xff]  }
 0x161   :  { %1365 = vmatpush1.bf16.msra.mxu0 %v3807_v53  ;;  %2133 = vmatpush1.bf16.msra.mxu1 %v3810_v54  ;;  %v4261_v5 = vpack.c.bf16 %v4054_v61, %v4050_v59  ;;  %v3885_v53 = vld [vmem:[#allocation4 + $0x450] ss:$12 sps:$4 sm:$0xff]   ;;  %v3889_v54 = vld [vmem:[#allocation4 + $0x398] ss:$12 sps:$4 sm:$0xff]   ;;  %v3895_v61 = vld [vmem:[#allocation4 + $0x480] ss:$12 sps:$4 sm:$0xff]  }
 0x162   :  { %1366 = vmatprep.subr.bf16.mxu0 %v3815_v57  ;;  %2134 = vmatprep.subr.bf16.mxu1 %v3818_v58  ;;  %v3890_v57 = vld [vmem:[#allocation4 + $0x468] ss:$12 sps:$4 sm:$0xff]   ;;  %v3894_v58 = vld [vmem:[#allocation4 + $0x3b0] ss:$12 sps:$4 sm:$0xff]  }
 0x163   :  { %2164 = vmatprep.mubr.bf16.mxu1 %v4256_v55  ;;  %v3897_v59 = vld [vmem:[#allocation4 + $0x484] ss:$12 sps:$4 sm:$0xff]  }
 0x165   :  { %1367 = vmatpush1.bf16.msra.mxu0 %v3813_v62  ;;  %2135 = vmatpush1.bf16.msra.mxu1 %v3816_v63  ;;  %v3899_v62 = vld [vmem:[#allocation4 + $0x488] ss:$12 sps:$4 sm:$0xff]  }
 0x166   :  { %1368 = vmatprep.subr.bf16.mxu0 %v3821_v3  ;;  %2136 = vmatprep.subr.bf16.mxu1 %v3824_v4  ;;  %v3902_v63 = vld [vmem:[#allocation4 + $0x49c] ss:$12 sps:$4 sm:$0xff]   ;;  %v3903_v3 = vld [vmem:[#allocation4 + $0x560] ss:$12 sps:$4 sm:$0xff]   ;;  %v3900_v4 = vld [vmem:[#allocation4 + $0x498] ss:$12 sps:$4 sm:$0xff]  }
 0x169   :  { %1369 = vmatpush1.bf16.msra.mxu0 %v3819_v6  ;;  %2137 = vmatpush1.bf16.msra.mxu1 %v3822_v7  ;;  %v3904_v6 = vld [vmem:[#allocation4 + $0x4a0] ss:$12 sps:$4 sm:$0xff]  }
 0x16a   :  { %1370 = vmatprep.subr.bf16.mxu0 %v3827_v8  ;;  %2138 = vmatprep.subr.bf16.mxu1 %v3830_v9  ;;  %v3907_v7 = vld [vmem:[#allocation4 + $0x4b4] ss:$12 sps:$4 sm:$0xff]   ;;  %v3908_v8 = vld [vmem:[#allocation4 + $0x578] ss:$12 sps:$4 sm:$0xff]   ;;  %v3905_v9 = vld [vmem:[#allocation4 + $0x4b0] ss:$12 sps:$4 sm:$0xff]  }
 0x16d   :  { %1371 = vmatpush1.bf16.msra.mxu0 %v3825_v10  ;;  %2139 = vmatpush1.bf16.msra.mxu1 %v3828_v11  ;;  %v3909_v10 = vld [vmem:[#allocation4 + $0x4b8] ss:$12 sps:$4 sm:$0xff]  }
 0x16e   :  { %1372 = vmatprep.subr.bf16.mxu0 %v3833_v12  ;;  %2140 = vmatprep.subr.bf16.mxu1 %v3836_v13  ;;  %v3912_v11 = vld [vmem:[#allocation4 + $0x4cc] ss:$12 sps:$4 sm:$0xff]   ;;  %v3910_v12 = vld [vmem:[#allocation4 + $0x4c8] ss:$12 sps:$4 sm:$0xff]   ;;  %v3914_v13 = vld [vmem:[#allocation4 + $0x4d0] ss:$12 sps:$4 sm:$0xff]  }
 0x171   :  { %1373 = vmatpush1.bf16.msra.mxu0 %v3831_v15  ;;  %2141 = vmatpush1.bf16.msra.mxu1 %v3834_v16  ;;  %v3917_v15 = vld [vmem:[#allocation4 + $0x4e4] ss:$12 sps:$4 sm:$0xff]   ;;  %v3918_v16 = vld [vmem:[#allocation4 + $0x5a8] ss:$12 sps:$4 sm:$0xff]  }
 0x172   :  { %1374 = vmatprep.subr.bf16.mxu0 %v3839_v17  ;;  %2142 = vmatprep.subr.bf16.mxu1 %v3842_v18  ;;  %v3915_v17 = vld [vmem:[#allocation4 + $0x4e0] ss:$12 sps:$4 sm:$0xff]   ;;  %v3922_v18 = vld [vmem:[#allocation4 + $0x4fc] ss:$12 sps:$4 sm:$0xff]  }
 0x175   :  { %1375 = vmatpush1.bf16.msra.mxu0 %v3837_v19  ;;  %2143 = vmatpush1.bf16.msra.mxu1 %v3840_v20  ;;  %v3923_v19 = vld [vmem:[#allocation4 + $0x5c0] ss:$12 sps:$4 sm:$0xff]   ;;  %v3920_v20 = vld [vmem:[#allocation4 + $0x4f8] ss:$12 sps:$4 sm:$0xff]  }
 0x176   :  { %1376 = vmatprep.subr.bf16.mxu0 %v3845_v21  ;;  %2144 = vmatprep.subr.bf16.mxu1 %v3848_v22  ;;  %v3924_v21 = vld [vmem:[#allocation4 + $0x500] ss:$12 sps:$4 sm:$0xff]  }
 0x177   :  { %v3927_v22 = vld [vmem:[#allocation4 + $0x514] ss:$12 sps:$4 sm:$0xff]  }
 0x179   :  { %1377 = vmatpush1.bf16.msra.mxu0 %v3843_v1  ;;  %2145 = vmatpush1.bf16.msra.mxu1 %v3846_v23  ;;  %v3928_v1 = vld [vmem:[#allocation4 + $0x5d8] ss:$12 sps:$4 sm:$0xff]   ;;  %v3925_v23 = vld [vmem:[#allocation4 + $0x510] ss:$12 sps:$4 sm:$0xff]  }
 0x17a   :  { %1378 = vmatprep.subr.bf16.mxu0 %v3851_v24  ;;  %2146 = vmatprep.subr.bf16.mxu1 %v3854_v25  ;;  %v3929_v24 = vld [vmem:[#allocation4 + $0x518] ss:$12 sps:$4 sm:$0xff]  }
 0x17b   :  { %v3932_v25 = vld [vmem:[#allocation4 + $0x52c] ss:$12 sps:$4 sm:$0xff]  }
 0x17d   :  { %1379 = vmatpush1.bf16.msra.mxu0 %v3849_v26  ;;  %2147 = vmatpush1.bf16.msra.mxu1 %v3852_v27  ;;  %v3933_v26 = vld [vmem:[#allocation4 + $0x5f0] ss:$12 sps:$4 sm:$0xff]   ;;  %v3930_v27 = vld [vmem:[#allocation4 + $0x528] ss:$12 sps:$4 sm:$0xff]  }
 0x17e   :  { %2148 = vmatprep.subr.bf16.mxu1 %v3857_v28  ;;  %3470 = vmatprep.subr.bf16.mxu0 %v3858_v29  ;;  %v3934_v28 = vld [vmem:[#allocation4 + $0x530] ss:$12 sps:$4 sm:$0xff]  }
 0x17f   :  { %v3937_v29 = vld [vmem:[#allocation4 + $0x544] ss:$12 sps:$4 sm:$0xff]  }
 0x180   :  { %1381 = vmatmul.mubr.bf16.vlgmr.msra.gmra.mrb[8].mxu0 %v4252_v14  ;;  %v3870_v14 = vld [vmem:[#allocation4 + $0x408] ss:$12 sps:$4 sm:$0xff]  }
 0x181   :  { %2149 = vmatpush1.bf16.msra.mxu1 %v3855_v30  ;;  %3471 = vmatpush3.bf16.msra.mxu0 %v3859_v31  ;;  %v3967_v30 = vld [vmem:[#allocation6 + $0x40] sm:$0xff]  }
 0x182   :  { %2150 = vmatprep.subr.bf16.mxu1 %v3862_v32  ;;  %3472 = vmatprep.subr.bf16.mxu0 %v3863_v33  ;;  %v3935_v31 = vld [vmem:[#allocation4 + $0x540] ss:$12 sps:$4 sm:$0xff]   ;;  %v3940_v33 = vld [vmem:[#allocation4 + $0x55c] ss:$12 sps:$4 sm:$0xff]  }
 0x183   :  { %2250 = vmatprep.mubr.bf16.mxu0 %v4256_v55  ;;  %v3892_v55 = vld [vmem:[#allocation4 + $0x46c] ss:$12 sps:$4 sm:$0xff]   ;;  %v3968_v32 = vld [vmem:[#allocation6] sm:$0xff]  }
 0x185   :  { %2151 = vmatpush1.bf16.msra.mxu1 %v3860_v34  ;;  %3473 = vmatpush3.bf16.msra.mxu0 %v3864_v35  ;;  %v3938_v34 = vld [vmem:[#allocation4 + $0x558] ss:$12 sps:$4 sm:$0xff]   ;;  %v3943_v35 = vld [vmem:[#allocation4 + $0x574] ss:$12 sps:$4 sm:$0xff]  }
 0x186   :  { %2152 = vmatprep.subr.bf16.mxu1 %v3867_v36  ;;  %3474 = vmatprep.subr.bf16.mxu0 %v3868_v37  ;;  %v3941_v36 = vld [vmem:[#allocation4 + $0x570] ss:$12 sps:$4 sm:$0xff]   ;;  %v3946_v37 = vld [vmem:[#allocation4 + $0x58c] ss:$12 sps:$4 sm:$0xff]  }
 0x189   :  { %2153 = vmatpush1.bf16.msra.mxu1 %v3865_v38  ;;  %3475 = vmatpush3.bf16.msra.mxu0 %v3869_v39  ;;  %v3969_v38 = vld [vmem:[#allocation6 + $0x48] sm:$0xff]  }
 0x18a   :  { %2154 = vmatprep.subr.bf16.mxu1 %v3872_v40  ;;  %3476 = vmatprep.subr.bf16.mxu0 %v3873_v41  ;;  %v3970_v39 = vld [vmem:[#allocation6 + $0x8] sm:$0xff]   ;;  %v3971_v40 = vld [vmem:[#allocation6 + $0x50] sm:$0xff]  }
 0x18b   :  { %v3944_v41 = vld [vmem:[#allocation4 + $0x588] ss:$12 sps:$4 sm:$0xff]  }
 0x18d   :  { %2155 = vmatpush1.bf16.msra.mxu1 %v3870_v14  ;;  %3477 = vmatpush3.bf16.msra.mxu0 %v3874_v42  ;;  %v3949_v14 = vld [vmem:[#allocation4 + $0x5a4] ss:$12 sps:$4 sm:$0xff]  }
 0x18e   :  { %2156 = vmatprep.subr.bf16.mxu1 %v3877_v43  ;;  %3478 = vmatprep.subr.bf16.mxu0 %v3878_v44  ;;  %v3972_v42 = vld [vmem:[#allocation6 + $0x10] sm:$0xff]   ;;  %v3947_v43 = vld [vmem:[#allocation4 + $0x5a0] ss:$12 sps:$4 sm:$0xff]   ;;  %v3952_v44 = vld [vmem:[#allocation4 + $0x5bc] ss:$12 sps:$4 sm:$0xff]  }
 0x191   :  { %2157 = vmatpush1.bf16.msra.mxu1 %v3875_v0  ;;  %3479 = vmatpush3.bf16.msra.mxu0 %v3879_v45  ;;  %v3950_v0 = vld [vmem:[#allocation4 + $0x5b8] ss:$12 sps:$4 sm:$0xff]  }
 0x192   :  { %2158 = vmatprep.subr.bf16.mxu1 %v3882_v46  ;;  %3480 = vmatprep.subr.bf16.mxu0 %v3883_v47  ;;  %v3973_v45 = vld [vmem:[#allocation6 + $0x58] sm:$0xff]   ;;  %v3955_v46 = vld [vmem:[#allocation4 + $0x5d4] ss:$12 sps:$4 sm:$0xff]  }
 0x193   :  { %v3974_v47 = vld [vmem:[#allocation6 + $0x18] sm:$0xff]  }
 0x195   :  { %2159 = vmatpush1.bf16.msra.mxu1 %v3880_v48  ;;  %3481 = vmatpush3.bf16.msra.mxu0 %v3884_v49  ;;  %v3953_v48 = vld [vmem:[#allocation4 + $0x5d0] ss:$12 sps:$4 sm:$0xff]   ;;  %v3975_v49 = vld [vmem:[#allocation6 + $0x60] sm:$0xff]  }
 0x196   :  { %2160 = vmatprep.subr.bf16.mxu1 %v3887_v50  ;;  %3482 = vmatprep.subr.bf16.mxu0 %v3888_v51  ;;  %v3958_v50 = vld [vmem:[#allocation4 + $0x5ec] ss:$12 sps:$4 sm:$0xff]   ;;  %v3976_v51 = vld [vmem:[#allocation6 + $0x20] sm:$0xff]  }
 0x199   :  { %2161 = vmatpush1.bf16.msra.mxu1 %v3885_v53  ;;  %3483 = vmatpush3.bf16.msra.mxu0 %v3889_v54  ;;  %v3956_v53 = vld [vmem:[#allocation4 + $0x5e8] ss:$12 sps:$4 sm:$0xff]  }
 0x19a   :  { %2162 = vmatprep.subr.bf16.mxu1 %v3892_v55  ;;  %3484 = vmatprep.subr.bf16.mxu0 %v3893_v56  ;;  %v3977_v54 = vld [vmem:[#allocation6 + $0x68] sm:$0xff]   ;;  %v3979_v56 = vld [vmem:[#allocation6 + $0x70] sm:$0xff]  }
 0x19b   :  { %v3978_v55 = vld [vmem:[#allocation6 + $0x28] sm:$0xff]  }
 0x19d   :  { %2163 = vmatpush1.bf16.msra.mxu1 %v3890_v57  ;;  %3485 = vmatpush3.bf16.msra.mxu0 %v3894_v58  ;;  %v3980_v57 = vld [vmem:[#allocation6 + $0x30] sm:$0xff]   ;;  %v3959_v58 = vld [vmem:[#allocation6 + $0x80] sm:$0xff]  }
 0x19e   :  { %2175 = vmatprep.subr.bf16.mxu1 %v3897_v59  ;;  %3492 = vmatprep.subr.bf16.mxu0 %v3898_v60  ;;  %v4171_v59 = vmov 0.0   ;;  %v3981_v60 = vld [vmem:[#allocation6 + $0x78] sm:$0xff]  }
 0x1a0   :  { %2165 = vmatmul.mubr.bf16.vlgmr.msra.gmra.mrb[16].mxu1 %v4254_v52  ;;  %2251 = vmatmul.mubr.bf16.vlgmr.msra.gmra.mrb[12].mxu0 %v4254_v52  ;;  %v3913_v52 = vld [vmem:[#allocation4 + $0x590] ss:$12 sps:$4 sm:$0xff]  }
 0x1a1   :  { %2176 = vmatpush1.bf16.msra.mxu1 %v3895_v61  ;;  %3493 = vmatpush3.bf16.msra.mxu0 %v3899_v62  ;;  %v3982_v61 = vld [vmem:[#allocation6 + $0x38] sm:$0xff]   ;;  %v3960_v62 = vld [vmem:[#allocation6 + $0x88] sm:$0xff]  }
 0x1a2   :  { %2177 = vmatprep.subr.bf16.mxu1 %v3902_v63  ;;  %3494 = vmatprep.subr.bf16.mxu0 %v3903_v3  ;;  %v3961_v63 = vld [vmem:[#allocation6 + $0x90] sm:$0xff]   ;;  %v3962_v3 = vld [vmem:[#allocation6 + $0x98] sm:$0xff]  }
 0x1a3   :  { %2291 = vmatprep.mubr.bf16.mxu0 %v4261_v5  ;;  %2207 = vmatprep.mubr.bf16.mxu1 %v4261_v5  ;;  %v3919_v5 = vld [vmem:[#allocation4 + $0x4e8] ss:$12 sps:$4 sm:$0xff]  }
 0x1a5   :  { %2178 = vmatpush1.bf16.msra.mxu1 %v3900_v4  ;;  %3495 = vmatpush3.bf16.msra.mxu0 %v3904_v6  ;;  %v3964_v4 = vld [vmem:[#allocation6 + $0xa8] sm:$0xff]   ;;  %v3965_v6 = vld [vmem:[#allocation6 + $0xb0] sm:$0xff]  }
 0x1a6   :  { %2179 = vmatprep.subr.bf16.mxu1 %v3907_v7  ;;  %3496 = vmatprep.subr.bf16.mxu0 %v3908_v8  ;;  %v3966_v7 = vld [vmem:[#allocation6 + $0xb8] sm:$0xff]  }
 0x1a9   :  { %2180 = vmatpush1.bf16.msra.mxu1 %v3905_v9  ;;  %3497 = vmatpush3.bf16.msra.mxu0 %v3909_v10 }
 0x1aa   :  { %2181 = vmatprep.subr.bf16.mxu1 %v3912_v11  ;;  %3498 = vmatprep.subr.bf16.mxu0 %v3913_v52 }
 0x1ad   :  { %2182 = vmatpush1.bf16.msra.mxu1 %v3910_v12  ;;  %3499 = vmatpush3.bf16.msra.mxu0 %v3914_v13  ;;  %v3991_v13 = vld [vmem:[#allocation6 + $0x140] sm:$0xff]  }
 0x1ae   :  { %2183 = vmatprep.subr.bf16.mxu1 %v3917_v15  ;;  %3500 = vmatprep.subr.bf16.mxu0 %v3918_v16  ;;  %v781_v15 = vlaneseq }
 0x1b0   :  { %v4283_v16 = vshrl.u32 %v781_v15, 7  ;;  %v4005_v15 = vld [vmem:[#allocation6 + $0x178] sm:$0xff]  }
 0x1b1   :  { %2184 = vmatpush1.bf16.msra.mxu1 %v3915_v17  ;;  %3501 = vmatpush3.bf16.msra.mxu0 %v3919_v5  ;;  %v4289_v5 = vld [vmem:[%s4361_s4 + $0x10] sm:$0xff] }
 0x1b2   :  { %2185 = vmatprep.subr.bf16.mxu1 %v3922_v18  ;;  %3502 = vmatprep.subr.bf16.mxu0 %v3923_v19  ;;  %v783_v17 = vsub.s32 0, %v4283_v16 }
 0x1b4   :  { %v792_v18 = vrot.slane %v4289_v5, %v783_v17 }
 0x1b5   :  { %2186 = vmatpush1.bf16.msra.mxu1 %v3920_v20  ;;  %3503 = vmatpush3.bf16.msra.mxu0 %v3924_v21 }
 0x1b6   :  { %2187 = vmatprep.subr.bf16.mxu1 %v3927_v22  ;;  %3504 = vmatprep.subr.bf16.mxu0 %v3928_v1 }
 0x1b9   :  { %2188 = vmatpush1.bf16.msra.mxu1 %v3925_v23  ;;  %3505 = vmatpush3.bf16.msra.mxu0 %v3929_v24 }
 0x1ba   :  { %2189 = vmatprep.subr.bf16.mxu1 %v3932_v25  ;;  %3506 = vmatprep.subr.bf16.mxu0 %v3933_v26 }
 0x1bd   :  { %2190 = vmatpush1.bf16.msra.mxu1 %v3930_v27  ;;  %3507 = vmatpush3.bf16.msra.mxu0 %v3934_v28 }
 0x1be   :  { %2191 = vmatprep.subr.bf16.mxu1 %v3937_v29  ;;  %3514 = vmatprep.subr.bf16.mxu0 %v3967_v30  ;;  %v3983_v30 = vld [vmem:[#allocation6 + $0x180] sm:$0xff]  }
 0x1c0   :  { %2292 = vmatmul.mubr.bf16.vlgmr.msra.gmra.mrb[16].mxu0 %v4259_v2 }
 0x1c1   :  { %2192 = vmatpush1.bf16.msra.mxu1 %v3935_v31  ;;  %3515 = vmatpush3.bf16.msra.mxu0 %v3968_v32  ;;  %v3984_v32 = vld [vmem:[#allocation6 + $0x188] sm:$0xff]  }
 0x1c2   :  { %2193 = vmatprep.subr.bf16.mxu1 %v3940_v33  ;;  %3516 = vmatprep.subr.bf16.mxu0 %v3969_v38  ;;  %v4298_v33 = vld [vmem:[%s4361_s4] sm:$0xff]  ;;  %v3986_v38 = vld [vmem:[#allocation6 + $0x198] sm:$0xff]  }
 0x1c5   :  { %2194 = vmatpush1.bf16.msra.mxu1 %v3938_v34  ;;  %3517 = vmatpush3.bf16.msra.mxu0 %v3970_v39  ;;  %v3985_v34 = vld [vmem:[#allocation6 + $0x190] sm:$0xff]  }
 0x1c6   :  { %2195 = vmatprep.subr.bf16.mxu1 %v3943_v35  ;;  %3518 = vmatprep.subr.bf16.mxu0 %v3971_v40  ;;  %v4303_v35 = vld [vmem:[%s4361_s4 + $0x8] sm:$0xff] }
 0x1c9   :  { %2196 = vmatpush1.bf16.msra.mxu1 %v3941_v36  ;;  %3519 = vmatpush3.bf16.msra.mxu0 %v3972_v42  ;;  %v784_v36 = vrot.slane %v4298_v33, %v783_v17 }
 0x1ca   :  { %2197 = vmatprep.subr.bf16.mxu1 %v3946_v37  ;;  %3520 = vmatprep.subr.bf16.mxu0 %v3973_v45  ;;  %v788_v37 = vrot.slane %v4303_v35, %v783_v17  ;;  %v4006_v17 = vld [vmem:[#allocation6 + $0x138] sm:$0xff]  }
 0x1cd   :  { %2198 = vmatpush1.bf16.msra.mxu1 %v3944_v41  ;;  %3521 = vmatpush3.bf16.msra.mxu0 %v3974_v47  ;;  %v3989_v47 = vld [vmem:[#allocation6 + $0x1b0] sm:$0xff]  }
 0x1ce   :  { %2199 = vmatprep.subr.bf16.mxu1 %v3949_v14  ;;  %3522 = vmatprep.subr.bf16.mxu0 %v3975_v49 }
 0x1d1   :  { %2200 = vmatpush1.bf16.msra.mxu1 %v3947_v43  ;;  %3523 = vmatpush3.bf16.msra.mxu0 %v3976_v51  ;;  %v3987_v43 = vld [vmem:[#allocation6 + $0x1a0] sm:$0xff]  }
 0x1d2   :  { %2201 = vmatprep.subr.bf16.mxu1 %v3952_v44  ;;  %3524 = vmatprep.subr.bf16.mxu0 %v3977_v54 }
 0x1d5   :  { %2202 = vmatpush1.bf16.msra.mxu1 %v3950_v0  ;;  %3525 = vmatpush3.bf16.msra.mxu0 %v3978_v55 }
 0x1d6   :  { %2203 = vmatprep.subr.bf16.mxu1 %v3955_v46  ;;  %3526 = vmatprep.subr.bf16.mxu0 %v3979_v56  ;;  %v3988_v46 = vld [vmem:[#allocation6 + $0x1a8] sm:$0xff]   ;;  %v3992_v56 = vld [vmem:[#allocation6 + $0x100] sm:$0xff]  }
 0x1d9   :  { %2204 = vmatpush1.bf16.msra.mxu1 %v3953_v48  ;;  %3527 = vmatpush3.bf16.msra.mxu0 %v3980_v57  ;;  %v3993_v57 = vld [vmem:[#allocation6 + $0x148] sm:$0xff]  }
 0x1da   :  { %2205 = vmatprep.subr.bf16.mxu1 %v3958_v50  ;;  %3528 = vmatprep.subr.bf16.mxu0 %v3981_v60  ;;  %v3990_v50 = vld [vmem:[#allocation6 + $0x1b8] sm:$0xff]   ;;  %v3995_v60 = vld [vmem:[#allocation6 + $0x150] sm:$0xff]  }
 0x1dd   :  { %2206 = vmatpush1.bf16.msra.mxu1 %v3956_v53  ;;  %3529 = vmatpush3.bf16.msra.mxu0 %v3982_v61  ;;  %v3996_v61 = vld [vmem:[#allocation6 + $0x110] sm:$0xff]  }
 0x1de   :  { %3594 = vmatprep.subr.bf16.mxu1 %v4171_v59  ;;  %3545 = vmatprep.subr.bf16.mxu0 %v3991_v13  ;;  %v4004_v13 = vld [vmem:[#allocation6 + $0x130] sm:$0xff]  }
 0x1e0   :  { %2208 = vmatmul.mubr.bf16.vlgmr.msra.gmra.mrb[16].mxu1 %v4259_v2  ;;  %v3963_v2 = vld [vmem:[#allocation6 + $0xa0] sm:$0xff]  }
 0x1e1   :  { %3595 = vmatpush3.bf16.msra.mxu1 %v3959_v58  ;;  %3610 = vmatprep.mubr.msk.bf16.mxu1 %vm4172_vm0, %v4171_v59  ;;  %v3994_v58 = vld [vmem:[#allocation6 + $0x108] sm:$0xff]  }
 0x1e2   :  { %3596 = vmatprep.subr.bf16.mxu1 %v4171_v59 }
 0x1e5   :  { %3597 = vmatpush3.bf16.msra.mxu1 %v3960_v62  ;;  %v3997_v62 = vld [vmem:[#allocation6 + $0x158] sm:$0xff]  }
 0x1e6   :  { %3598 = vmatprep.subr.bf16.mxu1 %v4171_v59 }
 0x1e9   :  { %3599 = vmatpush3.bf16.msra.mxu1 %v3961_v63  ;;  %v3998_v63 = vld [vmem:[#allocation6 + $0x118] sm:$0xff]  }
 0x1ea   :  { %3600 = vmatprep.subr.bf16.mxu1 %v4171_v59 }
 0x1ed   :  { %3601 = vmatpush3.bf16.msra.mxu1 %v3962_v3  ;;  %v3999_v3 = vld [vmem:[#allocation6 + $0x160] sm:$0xff]  }
 0x1ee   :  { %3602 = vmatprep.subr.bf16.mxu1 %v4171_v59 }
 0x1f1   :  { %3603 = vmatpush3.bf16.msra.mxu1 %v3963_v2 }
 0x1f2   :  { %3604 = vmatprep.subr.bf16.mxu1 %v4171_v59 }
 0x1f5   :  { %3605 = vmatpush3.bf16.msra.mxu1 %v3964_v4 }
 0x1f6   :  { %3606 = vmatprep.subr.bf16.mxu1 %v4171_v59 }
 0x1f9   :  { %3607 = vmatpush3.bf16.msra.mxu1 %v3965_v6  ;;  %v4000_v6 = vld [vmem:[#allocation6 + $0x120] sm:$0xff]  }
 0x1fa   :  { %3608 = vmatprep.subr.bf16.mxu1 %v4171_v59 }
 0x1fd   :  { %3609 = vmatpush3.bf16.msra.mxu1 %v3966_v7 }
 0x1fe   :  { %3614 = vmatprep.subr.bf16.mxu1 %v4171_v59 }
 0x213   :  { %v3442_v8 = vpop.f32.mrb[8].mxu1 }
 0x214   :  { %v3443_v9 = vpop.f32.mrb[9].mxu1 }
 0x215   :  { %v3444_v10 = vadd.f32 %v3443_v9, %v3442_v8  ;;  %v3445_v11 = vpop.f32.mrb[10].mxu1  ;;  %v4001_v9 = vld [vmem:[#allocation6 + $0x168] sm:$0xff]  }
 0x216   :  { %v3446_v52 = vpop.f32.mrb[11].mxu1 }
 0x217   :  { %v3447_v12 = vadd.f32 %v3446_v52, %v3445_v11  ;;  %v1426_v21 = vadd.f32 %v3444_v10, %v792_v18  ;;  %v4002_v52 = vld [vmem:[#allocation6 + $0x128] sm:$0xff]  }
 0x219   :  { %v1429_v24 = vadd.f32 %v3447_v12, %v792_v18  ;;  %v4003_v12 = vld [vmem:[#allocation6 + $0x170] sm:$0xff]   ;;  %v1610_v18 = vsub.s32 1, %v4283_v16 }
 0x233   :  { %v3464_v19 = vpop.f32.mrb[12].mxu1 }
 0x234   :  { %v3465_v20 = vpop.f32.mrb[13].mxu1 }
 0x235   :  { %v3466_v22 = vadd.f32 %v3465_v20, %v3464_v19  ;;  %v3467_v1 = vpop.f32.mrb[14].mxu1  ;;  %v1619_v19 = vrot.slane %v4289_v5, %v1610_v18  ;;  %v1611_v5 = vrot.slane %v4298_v33, %v1610_v18 }
 0x236   :  { %v3468_v23 = vpop.f32.mrb[15].mxu1 }
 0x237   :  { %v1467_v25 = vadd.f32 %v3466_v22, %v1426_v21  ;;  %v3469_v26 = vadd.f32 %v3468_v23, %v3467_v1 }
 0x239   :  { %v1470_v27 = vadd.f32 %v3469_v26, %v1429_v24  ;;  %4055 = vtanh.f32 %v1467_v25 }
 0x23b   :  { %4057 = vtanh.f32 %v1470_v27 }
 0x243   :  { %v4056_v28 = vpop.eup %4055 }
 0x245   :  { %v4058_v29 = vpop.eup %4057 }
 0x246   :  { %v2437_v31 = vpack.c.bf16 %v4058_v29, %v4056_v28 }
 0x248   :  { %3611 = vmatmul.mubr.bf16.vlgmr.msra.gmra.mrb[20].mxu1 %v2437_v31 }
 0x249   :  { %3615 = vmatpush3.bf16.msra.mxu1 %v3983_v30  ;;  %3630 = vmatprep.mubr.msk.bf16.mxu1 %vm4172_vm0, %v4171_v59 }
 0x24a   :  { %3616 = vmatprep.subr.bf16.mxu1 %v4171_v59 }
 0x24d   :  { %3617 = vmatpush3.bf16.msra.mxu1 %v3984_v32  ;;  %v1615_v32 = vrot.slane %v4303_v35, %v1610_v18  ;;  %v4008_v35 = vld [vmem:[#allocation6 + $0xc8] sm:$0xff]  }
 0x24e   :  { %3618 = vmatprep.subr.bf16.mxu1 %v4171_v59 }
 0x251   :  { %3619 = vmatpush3.bf16.msra.mxu1 %v3985_v34 }
 0x252   :  { %3620 = vmatprep.subr.bf16.mxu1 %v4171_v59 }
 0x253   :  { %v1382_v39 = vpop.f32.mrb[8].mxu0 }
 0x254   :  { %v3674_v40 = vadd.f32 %v1382_v39, %v784_v36  ;;  %v1384_v41 = vpop.f32.mrb[9].mxu0 }
 0x255   :  { %v3675_v14 = vadd.f32 %v1384_v41, %v788_v37  ;;  %v1386_v42 = vpop.f32.mrb[10].mxu0  ;;  %3621 = vmatpush3.bf16.msra.mxu1 %v3986_v38 }
 0x256   :  { %4059 = vtanh.f32 %v3674_v40  ;;  %v3676_v44 = vadd.f32 %v1386_v42, %v784_v36  ;;  %v1388_v0 = vpop.f32.mrb[11].mxu0  ;;  %3622 = vmatprep.subr.bf16.mxu1 %v4171_v59 }
 0x257   :  { %4061 = vtanh.f32 %v3675_v14  ;;  %v3677_v45 = vadd.f32 %v1388_v0, %v788_v37 }
 0x258   :  { %4063 = vtanh.f32 %v3676_v44 }
 0x259   :  { %4065 = vtanh.f32 %v3677_v45  ;;  %3623 = vmatpush3.bf16.msra.mxu1 %v3987_v43 }
 0x25a   :  { %3624 = vmatprep.subr.bf16.mxu1 %v4171_v59 }
 0x25d   :  { %3625 = vmatpush3.bf16.msra.mxu1 %v3988_v46 }
 0x25e   :  { %3626 = vmatprep.subr.bf16.mxu1 %v4171_v59 }
 0x260   :  { %v4060_v48 = vpop.eup %4059 }
 0x261   :  { %v4062_v49 = vpop.eup %4061  ;;  %3627 = vmatpush3.bf16.msra.mxu1 %v3989_v47  ;;  %v4007_v47 = vld [vmem:[#allocation6 + $0xc0] sm:$0xff]  }
 0x262   :  { %v4064_v51 = vpop.eup %4063  ;;  %3628 = vmatprep.subr.bf16.mxu1 %v4171_v59 }
 0x263   :  { %v4066_v53 = vpop.eup %4065  ;;  %v2435_v54 = vpack.c.bf16 %v4064_v51, %v4060_v48  ;;  %v4009_v48 = vld [vmem:[#allocation6 + $0xd0] sm:$0xff]   ;;  %v4012_v51 = vld [vmem:[#allocation6 + $0xe8] sm:$0xff]  }
 0x264   :  { %v2436_v55 = vpack.c.bf16 %v4066_v53, %v4062_v49  ;;  %v4010_v49 = vld [vmem:[#allocation6 + $0xd8] sm:$0xff]   ;;  %v4013_v53 = vld [vmem:[#allocation6 + $0xf0] sm:$0xff]  }
 0x265   :  { %3629 = vmatpush3.bf16.msra.mxu1 %v3990_v50  ;;  %v4011_v50 = vld [vmem:[#allocation6 + $0xe0] sm:$0xff]  }
 0x266   :  { %2618 = vmatprep.mubr.bf16.mxu0 %v2436_v55  ;;  %3654 = vmatprep.subr.bf16.mxu1 %v4171_v59  ;;  %v4015_v55 = vld [vmem:[#allocation6 + $0x1c0] sm:$0xff]  }
 0x267   :  { %2619 = vmatmul.mubr.bf16.vlgmr.msra.gmra.mrb[20].mxu0 %v2435_v54  ;;  %v4014_v54 = vld [vmem:[#allocation6 + $0xf8] sm:$0xff]  }
 0x268   :  { %3546 = vmatpush3.bf16.msra.mxu0 %v3992_v56  ;;  %v4016_v56 = vld [vmem:[#allocation6 + $0x1c8] sm:$0xff]  }
 0x269   :  { %3547 = vmatprep.subr.bf16.mxu0 %v3993_v57  ;;  %v4017_v57 = vld [vmem:[#allocation6 + $0x1d0] sm:$0xff]  }
 0x26c   :  { %3548 = vmatpush3.bf16.msra.mxu0 %v3994_v58 }
 0x26d   :  { %3549 = vmatprep.subr.bf16.mxu0 %v3995_v60 }
 0x270   :  { %3550 = vmatpush3.bf16.msra.mxu0 %v3996_v61  ;;  %v4018_v61 = vld [vmem:[#allocation6 + $0x1d8] sm:$0xff]  }
 0x271   :  { %3551 = vmatprep.subr.bf16.mxu0 %v3997_v62 }
 0x273   :  { %v3486_v2 = vpop.f32.mrb[12].mxu0 }
 0x274   :  { %v3487_v4 = vpop.f32.mrb[13].mxu0  ;;  %3552 = vmatpush3.bf16.msra.mxu0 %v3998_v63 }
 0x275   :  { %v3488_v7 = vadd.f32 %v3487_v4, %v3486_v2  ;;  %v3489_v8 = vpop.f32.mrb[14].mxu0  ;;  %3553 = vmatprep.subr.bf16.mxu0 %v3999_v3  ;;  %v4019_v3 = vld [vmem:[#allocation6 + $0x1e0] sm:$0xff]   ;;  %v4020_v2 = vld [vmem:[#allocation6 + $0x1e8] sm:$0xff]   ;;  %v4021_v4 = vld [vmem:[#allocation6 + $0x1f0] sm:$0xff]  }
 0x276   :  { %v3490_v10 = vpop.f32.mrb[15].mxu0 }
 0x277   :  { %v3491_v11 = vadd.f32 %v3490_v10, %v3489_v8  ;;  %v2253_v22 = vadd.f32 %v3488_v7, %v1619_v19  ;;  %v2440_v7 = vsub.s32 2, %v4283_v16 }
 0x278   :  { %3554 = vmatpush3.bf16.msra.mxu0 %v4000_v6  ;;  %v4022_v6 = vld [vmem:[#allocation6 + $0x1f8] sm:$0xff]  }
 0x279   :  { %3555 = vmatprep.subr.bf16.mxu0 %v4001_v9  ;;  %v2256_v25 = vadd.f32 %v3491_v11, %v1619_v19  ;;  %v2441_v9 = vrot.slane %v4298_v33, %v2440_v7 }
 0x27c   :  { %3556 = vmatpush3.bf16.msra.mxu0 %v4002_v52 }
 0x27d   :  { %3557 = vmatprep.subr.bf16.mxu0 %v4003_v12 }
 0x280   :  { %3558 = vmatpush3.bf16.msra.mxu0 %v4004_v13 }
 0x281   :  { %3559 = vmatprep.subr.bf16.mxu0 %v4005_v15 }
 0x284   :  { %3560 = vmatpush3.bf16.msra.mxu0 %v4006_v17 }
 0x285   :  { %3634 = vmatprep.subr.bf16.mxu0 %v4171_v59 }
 0x293   :  { %v3508_v20 = vpop.f32.mrb[16].mxu0 }
 0x294   :  { %v3509_v21 = vpop.f32.mrb[17].mxu0 }
 0x295   :  { %v3510_v1 = vadd.f32 %v3509_v21, %v3508_v20  ;;  %v3511_v23 = vpop.f32.mrb[18].mxu0 }
 0x296   :  { %v3512_v24 = vpop.f32.mrb[19].mxu0 }
 0x297   :  { %v2294_v26 = vadd.f32 %v3510_v1, %v2253_v22  ;;  %v3513_v27 = vadd.f32 %v3512_v24, %v3511_v23 }
 0x299   :  { %v2297_v28 = vadd.f32 %v3513_v27, %v2256_v25  ;;  %4067 = vtanh.f32 %v2294_v26  ;;  %v2675_v25 = vsub.s32 3, %v4283_v16 }
 0x29b   :  { %4069 = vtanh.f32 %v2297_v28  ;;  %v2676_v27 = vrot.slane %v4298_v33, %v2675_v25 }
 0x2a3   :  { %v4068_v29 = vpop.eup %4067 }
 0x2a5   :  { %v4070_v30 = vpop.eup %4069 }
 0x2a6   :  { %v2672_v31 = vpack.c.bf16 %v4070_v30, %v4068_v29 }
 0x2a8   :  { %3631 = vmatmul.mubr.bf16.vlgmr.msra.gmra.mrb[24].mxu1 %v2672_v31 }
 0x2a9   :  { %3670 = vmatprep.mubr.msk.bf16.mxu1 %vm4172_vm0, %v4171_v59  ;;  %3655 = vmatpush3.bf16.msra.mxu1 %v4015_v55 }
 0x2aa   :  { %3656 = vmatprep.subr.bf16.mxu1 %v4171_v59 }
 0x2ad   :  { %3657 = vmatpush3.bf16.msra.mxu1 %v4016_v56 }
 0x2ae   :  { %3658 = vmatprep.subr.bf16.mxu1 %v4171_v59 }
 0x2b1   :  { %3659 = vmatpush3.bf16.msra.mxu1 %v4017_v57 }
 0x2b2   :  { %3660 = vmatprep.subr.bf16.mxu1 %v4171_v59 }
 0x2b3   :  { %v2209_v34 = vpop.f32.mrb[16].mxu1 }
 0x2b4   :  { %v3678_v36 = vadd.f32 %v2209_v34, %v1611_v5  ;;  %v2211_v37 = vpop.f32.mrb[17].mxu1 }
 0x2b5   :  { %v3679_v38 = vadd.f32 %v2211_v37, %v1615_v32  ;;  %v2213_v39 = vpop.f32.mrb[18].mxu1  ;;  %3661 = vmatpush3.bf16.msra.mxu1 %v4018_v61 }
 0x2b6   :  { %4071 = vtanh.f32 %v3678_v36  ;;  %v3680_v40 = vadd.f32 %v2213_v39, %v1611_v5  ;;  %v2215_v41 = vpop.f32.mrb[19].mxu1  ;;  %3662 = vmatprep.subr.bf16.mxu1 %v4171_v59 }
 0x2b7   :  { %4073 = vtanh.f32 %v3679_v38  ;;  %v3681_v14 = vadd.f32 %v2215_v41, %v1615_v32  ;;  %v2908_v41 = vsub.s32 4, %v4283_v16 }
 0x2b8   :  { %4075 = vtanh.f32 %v3680_v40 }
 0x2b9   :  { %4077 = vtanh.f32 %v3681_v14  ;;  %3663 = vmatpush3.bf16.msra.mxu1 %v4019_v3  ;;  %v2909_v14 = vrot.slane %v4298_v33, %v2908_v41 }
 0x2ba   :  { %3664 = vmatprep.subr.bf16.mxu1 %v4171_v59 }
 0x2bd   :  { %3665 = vmatpush3.bf16.msra.mxu1 %v4020_v2 }
 0x2be   :  { %3666 = vmatprep.subr.bf16.mxu1 %v4171_v59 }
 0x2c0   :  { %v4072_v42 = vpop.eup %4071 }
 0x2c1   :  { %v4074_v43 = vpop.eup %4073  ;;  %3667 = vmatpush3.bf16.msra.mxu1 %v4021_v4 }
 0x2c2   :  { %v4076_v44 = vpop.eup %4075  ;;  %3668 = vmatprep.subr.bf16.mxu1 %v4171_v59 }
 0x2c3   :  { %v4078_v0 = vpop.eup %4077  ;;  %v2670_v45 = vpack.c.bf16 %v4076_v44, %v4072_v42 }
 0x2c4   :  { %v2671_v46 = vpack.c.bf16 %v4078_v0, %v4074_v43 }
 0x2c5   :  { %3669 = vmatpush3.bf16.msra.mxu1 %v4022_v6 }
 0x2c6   :  { %2853 = vmatprep.mubr.bf16.mxu0 %v2671_v46 }
 0x2c7   :  { %2854 = vmatmul.mubr.bf16.vlgmr.msra.gmra.mrb[24].mxu0 %v2670_v45 }
 0x2c8   :  { %3635 = vmatpush3.bf16.msra.mxu0 %v4007_v47  ;;  %3650 = vmatprep.mubr.msk.bf16.mxu0 %vm4172_vm0, %v4171_v59 }
 0x2c9   :  { %3636 = vmatprep.subr.bf16.mxu0 %v4171_v59 }
 0x2cc   :  { %3637 = vmatpush3.bf16.msra.mxu0 %v4008_v35 }
 0x2cd   :  { %3638 = vmatprep.subr.bf16.mxu0 %v4171_v59 }
 0x2d0   :  { %3639 = vmatpush3.bf16.msra.mxu0 %v4009_v48  ;;  %v3004_v48 = vsub.s32 5, %v4283_v16 }
 0x2d1   :  { %3640 = vmatprep.subr.bf16.mxu0 %v4171_v59 }
 0x2d4   :  { %3641 = vmatpush3.bf16.msra.mxu0 %v4010_v49  ;;  %v3005_v49 = vrot.slane %v4298_v33, %v3004_v48 }
 0x2d5   :  { %3642 = vmatprep.subr.bf16.mxu0 %v4171_v59 }
 0x2d8   :  { %3643 = vmatpush3.bf16.msra.mxu0 %v4011_v50 }
 0x2d9   :  { %3644 = vmatprep.subr.bf16.mxu0 %v4171_v59 }
 0x2dc   :  { %3645 = vmatpush3.bf16.msra.mxu0 %v4012_v51 }
 0x2dd   :  { %3646 = vmatprep.subr.bf16.mxu0 %v4171_v59 }
 0x2e0   :  { %3647 = vmatpush3.bf16.msra.mxu0 %v4013_v53 }
 0x2e1   :  { %3648 = vmatprep.subr.bf16.mxu0 %v4171_v59 }
 0x2e4   :  { %3649 = vmatpush3.bf16.msra.mxu0 %v4014_v54 }
 0x31b   :  { %v2661_v58 = vpop.f32.mrb[20].mxu1 }
 0x31c   :  { %v3612_v60 = vpop.f32.mrb[21].mxu1 }
 0x31d   :  { %v2664_v62 = vpop.f32.mrb[22].mxu1 }
 0x31e   :  { %v3613_v63 = vpop.f32.mrb[23].mxu1 }
 0x33a   :  { %v3530_v8 = vpop.f32.mrb[20].mxu0 }
 0x33b   :  { %v3531_v10 = vpop.f32.mrb[21].mxu0 }
 0x33c   :  { %v3532_v11 = vadd.f32 %v3531_v10, %v3530_v8  ;;  %v3533_v52 = vpop.f32.mrb[22].mxu0 }
 0x33d   :  { %v3534_v12 = vpop.f32.mrb[23].mxu0 }
 0x33e   :  { %v2621_v13 = vadd.f32 %v3532_v11, %v2441_v9  ;;  %v3535_v15 = vadd.f32 %v3534_v12, %v3533_v52 }
 0x340   :  { %v2662_v17 = vadd.f32 %v2661_v58, %v2621_v13  ;;  %v2624_v18 = vadd.f32 %v3535_v15, %v2441_v9 }
 0x342   :  { %v2665_v19 = vadd.f32 %v2664_v62, %v2624_v18  ;;  %4079 = vtanh.f32 %v2662_v17 }
 0x344   :  { %4081 = vtanh.f32 %v2665_v19 }
 0x34c   :  { %v4080_v20 = vpop.eup %4079 }
 0x34e   :  { %v4082_v21 = vpop.eup %4081 }
 0x34f   :  { %v2905_v59 = vpack.c.bf16 %v4082_v21, %v4080_v20 }
 0x351   :  { %3651 = vmatmul.mubr.bf16.vlgmr.msra.gmra.mrb[28].mxu0 %v2905_v59 }
 0x37b   :  { %v2896_v22 = vpop.f32.mrb[24].mxu1 }
 0x37c   :  { %v3632_v1 = vpop.f32.mrb[25].mxu1 }
 0x37d   :  { %v2899_v23 = vpop.f32.mrb[26].mxu1 }
 0x37e   :  { %v3633_v24 = vpop.f32.mrb[27].mxu1 }
 0x39a   :  { %v3561_v26 = vpop.f32.mrb[24].mxu0 }
 0x39b   :  { %v3562_v28 = vpop.f32.mrb[25].mxu0 }
 0x39c   :  { %v3563_v29 = vadd.f32 %v3562_v28, %v3561_v26  ;;  %v3564_v30 = vpop.f32.mrb[26].mxu0 }
 0x39d   :  { %v3565_v31 = vpop.f32.mrb[27].mxu0 }
 0x39e   :  { %v2856_v5 = vadd.f32 %v3563_v29, %v2676_v27  ;;  %v3566_v32 = vadd.f32 %v3565_v31, %v3564_v30 }
 0x3a0   :  { %v2897_v34 = vadd.f32 %v2896_v22, %v2856_v5  ;;  %v2859_v36 = vadd.f32 %v3566_v32, %v2676_v27 }
 0x3a2   :  { %v2900_v37 = vadd.f32 %v2899_v23, %v2859_v36  ;;  %4083 = vtanh.f32 %v2897_v34 }
 0x3a4   :  { %4085 = vtanh.f32 %v2900_v37 }
 0x3ac   :  { %v4084_v38 = vpop.eup %4083 }
 0x3ae   :  { %v4086_v39 = vpop.eup %4085 }
 0x3af   :  { %v3001_v40 = vpack.c.bf16 %v4086_v39, %v4084_v38 }
 0x3b1   :  { %3671 = vmatmul.mubr.bf16.vlgmr.msra.gmra.mrb[28].mxu1 %v3001_v40 }
 0x424   :  { %v2992_v42 = vpop.f32.mrb[28].mxu0 }
 0x425   :  { %v2993_v43 = vadd.f32 %v2992_v42, %v2909_v14  ;;  %v3652_v44 = vpop.f32.mrb[29].mxu0 }
 0x426   :  { %v2995_v0 = vpop.f32.mrb[30].mxu0 }
 0x427   :  { %4087 = vtanh.f32 %v2993_v43  ;;  %v2996_v45 = vadd.f32 %v2995_v0, %v2909_v14  ;;  %v3653_v46 = vpop.f32.mrb[31].mxu0 }
 0x429   :  { %4089 = vtanh.f32 %v2996_v45 }
 0x431   :  { %v4088_v47 = vpop.eup %4087 }
 0x432   :  { %3095 = vst [vmem:[%s4362_s5] sm:$0xff] %v4088_v47 }
 0x433   :  { %v4090_v35 = vpop.eup %4089 }
 0x434   :  { %3096 = vst [vmem:[%s4362_s5 + $0x10] sm:$0xff] %v4090_v35 }
 0x484   :  { %v3088_v50 = vpop.f32.mrb[28].mxu1 }
 0x485   :  { %v3089_v51 = vadd.f32 %v3088_v50, %v3005_v49  ;;  %v3672_v53 = vpop.f32.mrb[29].mxu1 }
 0x486   :  { %v3091_v54 = vpop.f32.mrb[30].mxu1 }
 0x487   :  { %3097 = vst [vmem:[%s4362_s5 + $0x8] sm:$0xff] %v3089_v51  ;;  %v3092_v55 = vadd.f32 %v3091_v54, %v3005_v49  ;;  %v3673_v56 = vpop.f32.mrb[31].mxu1 }
 0x489   :  { %3098 = vst [vmem:[%s4362_s5 + $0x18] sm:$0xff] %v3092_v55 }
 0x48a   :  { %3103 = vsyncpa [#allocation3], 1 }
 0x48b   :  { %3104 = vsyncpa [#allocation5], 1 }

</bundles_post_ra>
